<compile_context>
chip_gen: v6e
topology: v6e:2x2x1
jax: 0.10.0
libtpu: 0.0.40
codegen_flags: <defaults>
</compile_context>

<pallas_src>
import functools

import jax
import jax.numpy as jnp
import numpy as np
from jax.experimental import pallas as pl
from jax.experimental.pallas import tpu as pltpu


# ---------------------------------------------------------------------------
# Kernel 1: fused qkv-projection + multi-head attention (+ optional out-proj)
#   one batch element per grid step; all heads handled inside the step.
# ---------------------------------------------------------------------------
def _fused_attn_kernel(x_ref, qkvw_ref, *rest, num_heads, scale, fuse_proj):
    if fuse_proj:
        pw_ref, pb_ref, o_ref = rest
    else:
        (o_ref,) = rest

    x = x_ref[0].astype(jnp.float32)          # (Ns, C)
    w = qkvw_ref[...]                         # (C, 3C)
    C = x.shape[-1]
    hd = C // num_heads

    # qkv projection fused in (bias=False in the reference module).
    qkv = jnp.dot(x, w, preferred_element_type=jnp.float32)   # (Ns, 3C)

    head_outs = []
    for h in range(num_heads):                # static loop over heads
        q = qkv[:, h * hd:(h + 1) * hd]
        k = qkv[:, C + h * hd:C + (h + 1) * hd]
        v = qkv[:, 2 * C + h * hd:2 * C + (h + 1) * hd]
        # contract on last dims -> no explicit k.T / relayout before the MXU
        s = jax.lax.dot_general(q, k, (((1,), (1,)), ((), ())),
                                preferred_element_type=jnp.float32) * scale
        m = jnp.max(s, axis=-1, keepdims=True)
        p = jnp.exp(s - m)
        # EUP reciprocal instead of a VALU divide
        p = p * pl.reciprocal(jnp.sum(p, axis=-1, keepdims=True), approx=True)
        # attn_drop(p=0.0) is identity at inference.
        head_outs.append(jnp.dot(p, v, preferred_element_type=jnp.float32))

    o = jnp.concatenate(head_outs, axis=-1)   # (Ns, C), already (B, Ns, C) layout
    if fuse_proj:
        o = jnp.dot(o, pw_ref[...], preferred_element_type=jnp.float32) + pb_ref[...]
    o_ref[0] = o.astype(o_ref.dtype)


def fused_attention(x_in, qkv_w_t, num_heads, scale, proj_w_t=None, proj_b=None):
    # x_in: (B, Ns, C), qkv_w_t: (C, 3C); optional proj_w_t: (C, C), proj_b: (C,)
    B, Ns, C = x_in.shape
    fuse_proj = proj_w_t is not None

    in_specs = [
        pl.BlockSpec((1, Ns, C), lambda b: (b, 0, 0)),
        pl.BlockSpec((C, 3 * C), lambda b: (0, 0)),
    ]
    args = [x_in, qkv_w_t]
    if fuse_proj:
        in_specs += [
            pl.BlockSpec((C, C), lambda b: (0, 0)),
            pl.BlockSpec((1, C), lambda b: (0, 0)),
        ]
        args += [proj_w_t, proj_b.reshape(1, C)]

    return pl.pallas_call(
        functools.partial(_fused_attn_kernel, num_heads=num_heads,
                          scale=scale, fuse_proj=fuse_proj),
        out_shape=jax.ShapeDtypeStruct((B, Ns, C), x_in.dtype),
        grid=(B,),
        in_specs=in_specs,
        out_specs=pl.BlockSpec((1, Ns, C), lambda b: (b, 0, 0)),
        compiler_params=pltpu.CompilerParams(dimension_semantics=("parallel",)),
    )(*args)


# ---------------------------------------------------------------------------
# Kernel 2 (sr > 1 only): fused
#   depthwise ConvTranspose2d(k=stride=sr, groups=C)  (per-token scale+bias,
#   sr*sr output rows per input token)  +  LayerNorm(C)  +  output projection.
# Reads the small (B, Hs, Ws, C) map and the tiny (sr*sr, C) conv weight only.
# ---------------------------------------------------------------------------
def _upsample_ln_proj_kernel(x_ref, wk_ref, cb_ref, g_ref, b_ref, pw_ref, pb_ref,
                             o_ref, *, sr, eps):
    t0 = x_ref[0, 0].astype(jnp.float32)        # (Ws, C) one small-map row
    wk = wk_ref[...].astype(jnp.float32)        # (sr*sr, C)
    cb = cb_ref[...].astype(jnp.float32)        # (1, C)
    g = g_ref[...].astype(jnp.float32)          # (1, C)
    bb = b_ref[...].astype(jnp.float32)         # (1, C)
    pw = pw_ref[...]                            # (C, C)
    pb = pb_ref[...].astype(jnp.float32)        # (1, C)

    for ki in range(sr):
        for kj in range(sr):
            w_kij = wk[ki * sr + kj:ki * sr + kj + 1, :]        # (1, C)
            t = t0 * w_kij + cb                                  # conv-transpose
            mu = jnp.mean(t, axis=-1, keepdims=True)
            var = jnp.mean(jnp.square(t - mu), axis=-1, keepdims=True)
            y = (t - mu) * jax.lax.rsqrt(var + eps)
            y = y * g + bb                                       # LayerNorm
            z = jnp.dot(y, pw, preferred_element_type=jnp.float32) + pb  # proj
            # proj_drop(p=0.0) is identity.
            o_ref[0, ki, :, kj, :] = z.astype(o_ref.dtype)


def upsample_ln_proj(xo, conv_wk, conv_b, ln_g, ln_b, proj_w_t, proj_b,
                     H, W, sr, eps=1e-5):
    # xo: (B, Hs*Ws, C); conv_wk: (sr*sr, C); vectors: (C,); proj_w_t: (C, C)
    B, Ns, C = xo.shape
    Hs, Ws = H // sr, W // sr
    xo4 = xo.reshape(B, Hs, Ws, C)              # free reshape

    out5 = pl.pallas_call(
        functools.partial(_upsample_ln_proj_kernel, sr=sr, eps=eps),
        out_shape=jax.ShapeDtypeStruct((B, H, Ws, sr, C), xo.dtype),
        grid=(B, Hs),
        in_specs=[
            pl.BlockSpec((1, 1, Ws, C), lambda b, i: (b, i, 0, 0)),
            pl.BlockSpec((sr * sr, C), lambda b, i: (0, 0)),
            pl.BlockSpec((1, C), lambda b, i: (0, 0)),
            pl.BlockSpec((1, C), lambda b, i: (0, 0)),
            pl.BlockSpec((1, C), lambda b, i: (0, 0)),
            pl.BlockSpec((C, C), lambda b, i: (0, 0)),
            pl.BlockSpec((1, C), lambda b, i: (0, 0)),
        ],
        out_specs=pl.BlockSpec((1, sr, Ws, sr, C), lambda b, i: (b, i, 0, 0, 0)),
        compiler_params=pltpu.CompilerParams(
            dimension_semantics=("parallel", "parallel")),
    )(xo4, conv_wk, conv_b.reshape(1, C), ln_g.reshape(1, C), ln_b.reshape(1, C),
      proj_w_t, proj_b.reshape(1, C))

    # (B, H, Ws, sr, C): W index = j*sr + kj -> contiguous flatten to (B, H*W, C)
    return out5.reshape(B, H * W, C)


# ---------------------------------------------------------------------------
# Full module forward
# ---------------------------------------------------------------------------
def global_sparse_attn(x, H, W, params, num_heads, sr):
    B, N, C = x.shape
    hd = C // num_heads
    scale = hd ** -0.5

    qkv_w_t = params["qkv_w"].T                 # (C, 3C)
    proj_w_t = params["proj_w"].T               # (C, C)

    if sr > 1:
        # AvgPool2d(kernel_size=1, stride=sr) == strided spatial subsample.
        xs = x.reshape(B, H, W, C)[:, ::sr, ::sr, :]
        Hs, Ws = xs.shape[1], xs.shape[2]
        x_in = xs.reshape(B, Hs * Ws, C)
        xo = fused_attention(x_in, qkv_w_t, num_heads, scale)   # (B, Hs*Ws, C)
        # depthwise ConvTranspose2d weight -> (sr*sr, C): wk[ki*sr+kj, c]
        wk = params["conv_w"][:, 0].transpose(1, 2, 0).reshape(sr * sr, C)
        out = upsample_ln_proj(xo, wk, params["conv_b"], params["ln_g"],
                               params["ln_b"], proj_w_t, params["proj_b"],
                               H, W, sr)
    else:
        # single fused kernel: qkv + attention + output projection
        out = fused_attention(x, qkv_w_t, num_heads, scale,
                              proj_w_t=proj_w_t, proj_b=params["proj_b"])
    return out


# ---------------------------------------------------------------------------
# Pure-JAX reference (mirrors the PyTorch forward) for validation
# ---------------------------------------------------------------------------
def reference(x, H, W, params, num_heads, sr):
    B, N, C = x.shape
    hd = C // num_heads
    scale = hd ** -0.5
    if sr > 1:
        xs = x.reshape(B, H, W, C)[:, ::sr, ::sr, :]
        Hs, Ws = xs.shape[1], xs.shape[2]
        xin = xs.reshape(B, Hs * Ws, C)
    else:
        Hs, Ws = H, W
        xin = x
    Ns = xin.shape[1]
    qkv = xin @ params["qkv_w"].T
    qkv = qkv.reshape(B, Ns, 3, num_heads, hd).transpose(2, 0, 3, 1, 4)
    q, k, v = qkv[0], qkv[1], qkv[2]
    attn = jax.nn.softmax((q @ k.transpose(0, 1, 3, 2)) * scale, axis=-1)
    xo = (attn @ v).transpose(0, 2, 1, 3).reshape(B, Ns, C)
    if sr > 1:
        wk = params["conv_w"][:, 0].transpose(1, 2, 0)    # (sr, sr, C)
        up = (
            xo.reshape(B, Hs, 1, Ws, 1, C) * wk.reshape(1, 1, sr, 1, sr, C)
            + params["conv_b"]
        )
        up = up.reshape(B, H * W, C)
        mu = up.mean(-1, keepdims=True)
        var = ((up - mu) ** 2).mean(-1, keepdims=True)
        xo = (up - mu) / jnp.sqrt(var + 1e-5) * params["ln_g"] + params["ln_b"]
    return xo @ params["proj_w"].T + params["proj_b"]


if __name__ == "__main__":
    B, H, W, C = 2, 16, 16, 32
    num_heads = 4
    sr = 2
    N = H * W

    key = jax.random.PRNGKey(0)
    keys = jax.random.split(key, 8)
    x = jax.random.normal(keys[0], (B, N, C), jnp.float32)

    # Deterministic synthetic parameters (shapes follow the PyTorch __init__).
    params = dict(
        qkv_w=jax.random.normal(keys[1], (3 * C, C), jnp.float32) * 0.05,   # nn.Linear(C, 3C, bias=False)
        proj_w=jax.random.normal(keys[2], (C, C), jnp.float32) * 0.05,      # nn.Linear(C, C)
        proj_b=jax.random.normal(keys[3], (C,), jnp.float32) * 0.02,
        conv_w=jax.random.normal(keys[4], (C, 1, sr, sr), jnp.float32) * 0.1,  # ConvTranspose2d(C, C, sr, sr, groups=C)
        conv_b=jax.random.normal(keys[5], (C,), jnp.float32) * 0.02,
        ln_g=jnp.ones((C,), jnp.float32),                                    # nn.LayerNorm(C)
        ln_b=jnp.zeros((C,), jnp.float32),
    )

    # Tolerance covers the EUP approximate-reciprocal softmax normalization
    # (everything else is exact f32); structural bugs would be O(1) errors.
    tol = dict(rtol=5e-3, atol=5e-3)

    # sr = 2 path: subsample -> fused attn -> fused upsample+LN+proj
    out2 = jax.block_until_ready(global_sparse_attn(x, H, W, params, num_heads, 2))
    ref2 = reference(x, H, W, params, num_heads, 2)
    assert out2.shape == (B, N, C), out2.shape
    np.testing.assert_allclose(np.asarray(out2), np.asarray(ref2), **tol)

    # sr = 1 path: single fused attn+proj kernel
    out1 = jax.block_until_ready(global_sparse_attn(x, H, W, params, num_heads, 1))
    ref1 = reference(x, H, W, params, num_heads, 1)
    assert out1.shape == (B, N, C), out1.shape
    np.testing.assert_allclose(np.asarray(out1), np.asarray(ref1), **tol)

    print("KERNEL_OK")
</pallas_src>

<mosaic_0001>
module attributes {stable_mosaic.version = 11 : i64} {
  func.func @_fused_attn_kernel(%arg0: i32, %arg1: memref<1x64x32xf32, #tpu.memory_space<vmem>>, %arg2: memref<32x96xf32, #tpu.memory_space<vmem>>, %arg3: memref<1x64x32xf32, #tpu.memory_space<vmem>>) attributes {dimension_semantics = [#tpu.dimension_semantics<parallel>], iteration_bounds = array<i64: 2>, scalar_prefetch = 0 : i64, scratch_operands = 0 : i64, tpu.core_type = #tpu.core_type<tc>, window_params = [{transform_indices = @transform_0, window_bounds = array<i64: 1, 64, 32>}, {pipeline_mode = #tpu.pipeline_mode<synchronous>, transform_indices = @transform_1, window_bounds = array<i64: 32, 96>}, {transform_indices = @transform_2, window_bounds = array<i64: 1, 64, 32>}]} {
    %c0 = arith.constant 0 : index
    %c0_0 = arith.constant 0 : index
    %c0_1 = arith.constant 0 : index
    %0 = vector.load %arg1[%c0, %c0_0, %c0_1] : memref<1x64x32xf32, #tpu.memory_space<vmem>>, vector<1x64x32xf32>
    %1 = vector.shape_cast %0 : vector<1x64x32xf32> to vector<64x32xf32>
    %c0_2 = arith.constant 0 : index
    %c0_3 = arith.constant 0 : index
    %2 = vector.load %arg2[%c0_2, %c0_3] : memref<32x96xf32, #tpu.memory_space<vmem>>, vector<32x96xf32>
    %cst = arith.constant dense<0.000000e+00> : vector<64x96xf32>
    %3 = tpu.matmul %1, %2, %cst {dimension_numbers = #tpu.dot_dimension_numbers<[1], [0], [0], [1], [0, 0, 1, 1], [], []>} : vector<64x32xf32>, vector<32x96xf32>, vector<64x96xf32> -> vector<64x96xf32>
    %4 = vector.extract_strided_slice %3 {offsets = [0, 0], sizes = [64, 8], strides = [1, 1]} : vector<64x96xf32> to vector<64x8xf32>
    %5 = vector.extract_strided_slice %3 {offsets = [0, 32], sizes = [64, 8], strides = [1, 1]} : vector<64x96xf32> to vector<64x8xf32>
    %6 = vector.extract_strided_slice %3 {offsets = [0, 64], sizes = [64, 8], strides = [1, 1]} : vector<64x96xf32> to vector<64x8xf32>
    %cst_4 = arith.constant dense<0.000000e+00> : vector<64x64xf32>
    %7 = tpu.matmul %4, %5, %cst_4 {dimension_numbers = #tpu.dot_dimension_numbers<[1], [1], [0], [0], [0, 0, 1, 0], [], []>} : vector<64x8xf32>, vector<64x8xf32>, vector<64x64xf32> -> vector<64x64xf32>
    %cst_5 = arith.constant 0.353553385 : f32
    %8 = vector.broadcast %cst_5 : f32 to vector<64x64xf32>
    %9 = arith.mulf %7, %8 : vector<64x64xf32>
    %cst_6 = arith.constant dense<0xFF800000> : vector<64xf32>
    %10 = vector.multi_reduction <maximumf>, %9, %cst_6 [1] : vector<64x64xf32> to vector<64xf32>
    %11 = vector.shape_cast %10 : vector<64xf32> to vector<64x1xf32>
    %12 = vector.broadcast %11 : vector<64x1xf32> to vector<64x64xf32>
    %13 = arith.subf %9, %12 : vector<64x64xf32>
    %14 = math.exp %13 : vector<64x64xf32>
    %cst_7 = arith.constant dense<0.000000e+00> : vector<64xf32>
    %15 = vector.multi_reduction <add>, %14, %cst_7 [1] : vector<64x64xf32> to vector<64xf32>
    %16 = vector.shape_cast %15 : vector<64xf32> to vector<64x1xf32>
    %17 = tpu.reciprocal %16 {approx = true} : vector<64x1xf32> -> vector<64x1xf32>
    %18 = vector.broadcast %17 : vector<64x1xf32> to vector<64x64xf32>
    %19 = arith.mulf %14, %18 : vector<64x64xf32>
    %cst_8 = arith.constant dense<0.000000e+00> : vector<64x8xf32>
    %20 = tpu.matmul %19, %6, %cst_8 {dimension_numbers = #tpu.dot_dimension_numbers<[1], [0], [0], [1], [0, 0, 1, 1], [], []>} : vector<64x64xf32>, vector<64x8xf32>, vector<64x8xf32> -> vector<64x8xf32>
    %21 = vector.extract_strided_slice %3 {offsets = [0, 8], sizes = [64, 8], strides = [1, 1]} : vector<64x96xf32> to vector<64x8xf32>
    %22 = vector.extract_strided_slice %3 {offsets = [0, 40], sizes = [64, 8], strides = [1, 1]} : vector<64x96xf32> to vector<64x8xf32>
    %23 = vector.extract_strided_slice %3 {offsets = [0, 72], sizes = [64, 8], strides = [1, 1]} : vector<64x96xf32> to vector<64x8xf32>
    %cst_9 = arith.constant dense<0.000000e+00> : vector<64x64xf32>
    %24 = tpu.matmul %21, %22, %cst_9 {dimension_numbers = #tpu.dot_dimension_numbers<[1], [1], [0], [0], [0, 0, 1, 0], [], []>} : vector<64x8xf32>, vector<64x8xf32>, vector<64x64xf32> -> vector<64x64xf32>
    %cst_10 = arith.constant 0.353553385 : f32
    %25 = vector.broadcast %cst_10 : f32 to vector<64x64xf32>
    %26 = arith.mulf %24, %25 : vector<64x64xf32>
    %cst_11 = arith.constant dense<0xFF800000> : vector<64xf32>
    %27 = vector.multi_reduction <maximumf>, %26, %cst_11 [1] : vector<64x64xf32> to vector<64xf32>
    %28 = vector.shape_cast %27 : vector<64xf32> to vector<64x1xf32>
    %29 = vector.broadcast %28 : vector<64x1xf32> to vector<64x64xf32>
    %30 = arith.subf %26, %29 : vector<64x64xf32>
    %31 = math.exp %30 : vector<64x64xf32>
    %cst_12 = arith.constant dense<0.000000e+00> : vector<64xf32>
    %32 = vector.multi_reduction <add>, %31, %cst_12 [1] : vector<64x64xf32> to vector<64xf32>
    %33 = vector.shape_cast %32 : vector<64xf32> to vector<64x1xf32>
    %34 = tpu.reciprocal %33 {approx = true} : vector<64x1xf32> -> vector<64x1xf32>
    %35 = vector.broadcast %34 : vector<64x1xf32> to vector<64x64xf32>
    %36 = arith.mulf %31, %35 : vector<64x64xf32>
    %cst_13 = arith.constant dense<0.000000e+00> : vector<64x8xf32>
    %37 = tpu.matmul %36, %23, %cst_13 {dimension_numbers = #tpu.dot_dimension_numbers<[1], [0], [0], [1], [0, 0, 1, 1], [], []>} : vector<64x64xf32>, vector<64x8xf32>, vector<64x8xf32> -> vector<64x8xf32>
    %38 = vector.extract_strided_slice %3 {offsets = [0, 16], sizes = [64, 8], strides = [1, 1]} : vector<64x96xf32> to vector<64x8xf32>
    %39 = vector.extract_strided_slice %3 {offsets = [0, 48], sizes = [64, 8], strides = [1, 1]} : vector<64x96xf32> to vector<64x8xf32>
    %40 = vector.extract_strided_slice %3 {offsets = [0, 80], sizes = [64, 8], strides = [1, 1]} : vector<64x96xf32> to vector<64x8xf32>
    %cst_14 = arith.constant dense<0.000000e+00> : vector<64x64xf32>
    %41 = tpu.matmul %38, %39, %cst_14 {dimension_numbers = #tpu.dot_dimension_numbers<[1], [1], [0], [0], [0, 0, 1, 0], [], []>} : vector<64x8xf32>, vector<64x8xf32>, vector<64x64xf32> -> vector<64x64xf32>
    %cst_15 = arith.constant 0.353553385 : f32
    %42 = vector.broadcast %cst_15 : f32 to vector<64x64xf32>
    %43 = arith.mulf %41, %42 : vector<64x64xf32>
    %cst_16 = arith.constant dense<0xFF800000> : vector<64xf32>
    %44 = vector.multi_reduction <maximumf>, %43, %cst_16 [1] : vector<64x64xf32> to vector<64xf32>
    %45 = vector.shape_cast %44 : vector<64xf32> to vector<64x1xf32>
    %46 = vector.broadcast %45 : vector<64x1xf32> to vector<64x64xf32>
    %47 = arith.subf %43, %46 : vector<64x64xf32>
    %48 = math.exp %47 : vector<64x64xf32>
    %cst_17 = arith.constant dense<0.000000e+00> : vector<64xf32>
    %49 = vector.multi_reduction <add>, %48, %cst_17 [1] : vector<64x64xf32> to vector<64xf32>
    %50 = vector.shape_cast %49 : vector<64xf32> to vector<64x1xf32>
    %51 = tpu.reciprocal %50 {approx = true} : vector<64x1xf32> -> vector<64x1xf32>
    %52 = vector.broadcast %51 : vector<64x1xf32> to vector<64x64xf32>
    %53 = arith.mulf %48, %52 : vector<64x64xf32>
    %cst_18 = arith.constant dense<0.000000e+00> : vector<64x8xf32>
    %54 = tpu.matmul %53, %40, %cst_18 {dimension_numbers = #tpu.dot_dimension_numbers<[1], [0], [0], [1], [0, 0, 1, 1], [], []>} : vector<64x64xf32>, vector<64x8xf32>, vector<64x8xf32> -> vector<64x8xf32>
    %55 = vector.extract_strided_slice %3 {offsets = [0, 24], sizes = [64, 8], strides = [1, 1]} : vector<64x96xf32> to vector<64x8xf32>
    %56 = vector.extract_strided_slice %3 {offsets = [0, 56], sizes = [64, 8], strides = [1, 1]} : vector<64x96xf32> to vector<64x8xf32>
    %57 = vector.extract_strided_slice %3 {offsets = [0, 88], sizes = [64, 8], strides = [1, 1]} : vector<64x96xf32> to vector<64x8xf32>
    %cst_19 = arith.constant dense<0.000000e+00> : vector<64x64xf32>
    %58 = tpu.matmul %55, %56, %cst_19 {dimension_numbers = #tpu.dot_dimension_numbers<[1], [1], [0], [0], [0, 0, 1, 0], [], []>} : vector<64x8xf32>, vector<64x8xf32>, vector<64x64xf32> -> vector<64x64xf32>
    %cst_20 = arith.constant 0.353553385 : f32
    %59 = vector.broadcast %cst_20 : f32 to vector<64x64xf32>
    %60 = arith.mulf %58, %59 : vector<64x64xf32>
    %cst_21 = arith.constant dense<0xFF800000> : vector<64xf32>
    %61 = vector.multi_reduction <maximumf>, %60, %cst_21 [1] : vector<64x64xf32> to vector<64xf32>
    %62 = vector.shape_cast %61 : vector<64xf32> to vector<64x1xf32>
    %63 = vector.broadcast %62 : vector<64x1xf32> to vector<64x64xf32>
    %64 = arith.subf %60, %63 : vector<64x64xf32>
    %65 = math.exp %64 : vector<64x64xf32>
    %cst_22 = arith.constant dense<0.000000e+00> : vector<64xf32>
    %66 = vector.multi_reduction <add>, %65, %cst_22 [1] : vector<64x64xf32> to vector<64xf32>
    %67 = vector.shape_cast %66 : vector<64xf32> to vector<64x1xf32>
    %68 = tpu.reciprocal %67 {approx = true} : vector<64x1xf32> -> vector<64x1xf32>
    %69 = vector.broadcast %68 : vector<64x1xf32> to vector<64x64xf32>
    %70 = arith.mulf %65, %69 : vector<64x64xf32>
    %cst_23 = arith.constant dense<0.000000e+00> : vector<64x8xf32>
    %71 = tpu.matmul %70, %57, %cst_23 {dimension_numbers = #tpu.dot_dimension_numbers<[1], [0], [0], [1], [0, 0, 1, 1], [], []>} : vector<64x64xf32>, vector<64x8xf32>, vector<64x8xf32> -> vector<64x8xf32>
    %72 = tpu.concatenate %20, %37, %54, %71 in 1 : vector<64x8xf32>, vector<64x8xf32>, vector<64x8xf32>, vector<64x8xf32> -> vector<64x32xf32>
    %c0_24 = arith.constant 0 : index
    %c0_25 = arith.constant 0 : index
    %c0_26 = arith.constant 0 : index
    %73 = vector.load %arg3[%c0_24, %c0_25, %c0_26] : memref<1x64x32xf32, #tpu.memory_space<vmem>>, vector<1x64x32xf32>
    %74 = vector.shape_cast %73 : vector<1x64x32xf32> to vector<64x32xf32>
    %75 = vector.shape_cast %72 : vector<64x32xf32> to vector<1x64x32xf32>
    tpu.vector_store %arg3[%c0_24, %c0_25, %c0_26], %75 {strides = array<i32>} : memref<1x64x32xf32, #tpu.memory_space<vmem>>, vector<1x64x32xf32>,
    return
  }
  func.func @transform_0(%arg0: i32) -> (i32, i32, i32) {
    %c0_i32 = arith.constant 0 : i32
    %c0_i32_0 = arith.constant 0 : i32
    %c0_i32_1 = arith.constant 0 : i32
    return %arg0, %c0_i32, %c0_i32_0 : i32, i32, i32
  }
  func.func @transform_1(%arg0: i32) -> (i32, i32) {
    %c0_i32 = arith.constant 0 : i32
    %c0_i32_0 = arith.constant 0 : i32
    %c0_i32_1 = arith.constant 0 : i32
    return %c0_i32, %c0_i32_0 : i32, i32
  }
  func.func @transform_2(%arg0: i32) -> (i32, i32, i32) {
    %c0_i32 = arith.constant 0 : i32
    %c0_i32_0 = arith.constant 0 : i32
    %c0_i32_1 = arith.constant 0 : i32
    return %arg0, %c0_i32, %c0_i32_0 : i32, i32, i32
  }
}

</mosaic_0001>

<bundles_post_ra>
// kernel: tpu_custom_call.1
= control target key start
LH: loop header
LB: loop body
LE: loop exit
PB: predicated region body
PF: predicated region fallthrough
CT: control target
= control target key end

     0   :  { %s2825_s9 = smov 0   ;;  %s3471_s0 = inlined_call_operand.vmem [shape: f32[2,64,32], index: 0, kind: input, shape index: {}]   ;;  %s3472_s1 = inlined_call_operand.vmem [shape: f32[32,96], index: 1, kind: input, shape index: {}]   ;;  %s3473_s2 = inlined_call_operand.vmem [shape: f32[2,64,32], index: 2, kind: output, shape index: {}]  }
   0x1 LB: > { %s2137_s10 = sadd.s32 4294967295, %s2794_s9   ;;  %p2141_p0 = scmp.ge.s32.totalorder %s2794_s9, 1  ;;  %s2794_s9 = sphi %s2825_s9, %s12_s9  }
   0x2   : > { %p112_p1 = scmp.lt.s32.totalorder %s2794_s9, 3 }
   0x4   : > { %p113_p2 = pnand %p2141_p0, %p112_p1 }
   0x5   : > { %p134_p3 = scmp.lt.s32.totalorder (!%p113_p2), %s2137_s10, 1  ;;  %s2796_s23 = smov (!%p113_p2), 96  }
   0x6   : > { %116 = sbr.rel (%p113_p2) target bundleno = 2982 (0xba6), region = 28  ;;  %s2797_s24 = smov (!%p113_p2), 64  }
   0x7   : > { %s2798_s25 = smov (!%p113_p2), 88   ;;  %s2799_s26 = smov (!%p113_p2), 120  }
   0x8   : > { %s2800_s27 = smov (!%p113_p2), 56   ;;  %s2801_s28 = smov (!%p113_p2), 80  }
   0x9   : > { %s2802_s29 = smov (!%p113_p2), 112   ;;  %s2803_s30 = smov (!%p113_p2), 48  }
   0xa   : > { %s2804_s3 = smov (!%p113_p2), 72   ;;  %s2805_s4 = smov (!%p113_p2), 104  }
   0xb   : > { %v155_v0 = vld [vmem:[%s3472_s1 + $0x18] sm:$0xff]  ;;  %v154_v1 = vld [vmem:[%s3472_s1 + $0x10] sm:$0xff]  ;;  %v153_v2 = vld [vmem:[%s3472_s1 + $0x8] sm:$0xff]  ;;  %s3475_s10 = smov (!%p134_p3, %s2137_s10), 1  ;;  %vm156_vm0 = vcmask 261120   ;;  %vm310_vm1 = vcmask 64512  }
   0xc   : > { %2394 = vmatprep.subr.mxu0 %v155_v0  ;;  %v152_v3 = vld [vmem:[%s3472_s1] sm:$0xff]  ;;  %s2252_s19 = sshll.u32 %s3475_s10, 6  ;;  %vm456_vm2 = vcmask 523264   ;;  %s2806_s5 = smov 40   ;;  %vm2065_vm3 = vcmask 195584   ;;  %vm2056_vm4 = vcmask 130048  }
   0xd   : > { %2395 = vmatpush3.msra.mxu0 %v155_v0  ;;  %s138_s22 = scalar_lea.vmem %s3471_s0, %s2252_s19  ;;  %s2807_s6 = smov 8  }
   0xe   : > { %2396 = vmatprep.subr.mxu0 %v154_v1  ;;  %v144_v4 = vld [vmem:[%s138_s22] sm:$0xff]  ;;  %v145_v5 = vld [vmem:[%s138_s22 + $0x8] sm:$0xff]  ;;  %v146_v6 = vld [vmem:[%s138_s22 + $0x10] sm:$0xff]  ;;  %s2808_s7 = smov 16   ;;  %s2809_s8 = smov 24  }
   0xf   : > { %2397 = vmatpush3.msra.mxu0 %v154_v1  ;;  %2402 = vmatprep.mubr.msk.f32.mxu0 %vm156_vm0, %v144_v4  ;;  %v147_v7 = vld [vmem:[%s138_s22 + $0x18] sm:$0xff]  ;;  %v148_v8 = vld [vmem:[%s138_s22 + $0x20] sm:$0xff]  ;;  %v149_v9 = vld [vmem:[%s138_s22 + $0x28] sm:$0xff]  ;;  %s3418_s13 = scalar_lea.vmem %s3473_s2, %s2252_s19 }
  0x10   : > { %2398 = vmatprep.subr.mxu0 %v153_v2  ;;  %v150_v10 = vld [vmem:[%s138_s22 + $0x30] sm:$0xff]  ;;  %v151_v11 = vld [vmem:[%s138_s22 + $0x38] sm:$0xff] }
  0x11   : > { %2399 = vmatpush3.msra.mxu0 %v153_v2 }
  0x12   : > { %2400 = vmatprep.subr.mxu0 %v152_v3 }
  0x13   : > { %2401 = vmatpush3.msra.mxu0 %v152_v3 }
  0x14   : > { %2403 = vmatmul.mubr.msk.f32.vlgmr.msra.gmra.mxu0 %vm156_vm0, %v145_v5 }
  0x15   : > { %2405 = vmatprep.mubr.msk.f32.mxu0 %vm156_vm0, %v146_v6 }
  0x18   : > { %2406 = vmatmul.mubr.msk.f32.gmra.mxu0 %vm156_vm0, %v147_v7 }
  0x19   : > { %2408 = vmatprep.mubr.msk.f32.mxu0 %vm156_vm0, %v148_v8 }
  0x1c   : > { %2409 = vmatmul.mubr.msk.f32.gmra.mxu0 %vm156_vm0, %v149_v9 }
  0x1d   : > { %2411 = vmatprep.mubr.msk.f32.mxu0 %vm156_vm0, %v150_v10 }
  0x20   : > { %2412 = vmatmul.mubr.msk.f32.gmra.mxu0 %vm156_vm0, %v151_v11 }
  0xd4   : > { %v2861_v12 = vpop.f32.mrf.mxu0 }
  0xd6   : > { %v2863_v13 = vpop.f32.mrf.mxu0 }
  0xd7   : > { %2430 = vmatprep.mubr.msk.f32.mxu1 %vm310_vm1, %v2863_v13 }
  0xd8   : > { %v2867_v14 = vpop.f32.mrf.mxu0 }
  0xda   : > { %v2869_v15 = vpop.f32.mrf.mxu0 }
  0xdc   : > { %v2871_v16 = vpop.f32.mrf.mxu0 }
  0xdd   : > { %304 = vrot.lane.b32.xlu1 %v2871_v16, %s2796_s23 }
  0xde   : > { %v2874_v17 = vpop.f32.mrf.mxu0 }
  0xe0   : > { %v2876_v18 = vpop.f32.mrf.mxu0 }
  0xe1   : > { %302 = vrot.lane.b32.xlu1 %v2874_v17, %s2796_s23  ;;  %308 = vrot.lane.b32.xlu0 %v2876_v18, %s2796_s23 }
  0xe2   : > { %v2880_v19 = vpop.f32.mrf.mxu0 }
  0xe5   : > { %298 = vrot.lane.b32.xlu1 %v2869_v15, %s2796_s23  ;;  %306 = vrot.lane.b32.xlu0 %v2880_v19, %s2796_s23 }
  0xe9   : > { %294 = vrot.lane.b32.xlu1 %v2863_v13, %s2796_s23  ;;  %300 = vrot.lane.b32.xlu0 %v2867_v14, %s2796_s23 }
  0xed   : > { %559 = vrot.lane.b32.xlu1 %v2876_v18, %s2797_s24  ;;  %296 = vrot.lane.b32.xlu0 %v2861_v12, %s2796_s23 }
  0xf1   : > { %555 = vrot.lane.b32.xlu1 %v2871_v16, %s2797_s24  ;;  %551 = vrot.lane.b32.xlu0 %v2867_v14, %s2797_s24 }
  0xf5   : > { %553 = vrot.lane.b32.xlu1 %v2874_v17, %s2797_s24  ;;  %547 = vrot.lane.b32.xlu0 %v2861_v12, %s2797_s24 }
  0xf9   : > { %549 = vrot.lane.b32.xlu1 %v2869_v15, %s2797_s24  ;;  %728 = vrot.lane.b32.xlu0 %v2876_v18, %s2798_s25 }
  0xfd   : > { %545 = vrot.lane.b32.xlu1 %v2863_v13, %s2797_s24  ;;  %557 = vrot.lane.b32.xlu0 %v2880_v19, %s2797_s24 }
 0x101   : > { %726 = vrot.lane.b32.xlu1 %v2880_v19, %s2798_s25 }
 0x14f   : > { %v305_v20 = vpop.permute.xlu1 %304 }
 0x153   : > { %v303_v21 = vpop.permute.xlu1 %302  ;;  %v309_v22 = vpop.permute.xlu0 %308 }
 0x154   : > { %2414 = vmatprep.subr.msk.mxu1 %vm310_vm1, %v309_v22 }
 0x155   : > { %2415 = vmatpush3.xpose.msk.msra.mxu1 %vm310_vm1, %v309_v22 }
 0x157   : > { %v299_v23 = vpop.permute.xlu1 %298  ;;  %v307_v24 = vpop.permute.xlu0 %306 }
 0x158   : > { %2416 = vmatprep.subr.msk.mxu1 %vm310_vm1, %v307_v24 }
 0x159   : > { %2417 = vmatpush3.xpose.msk.msra.mxu1 %vm310_vm1, %v307_v24 }
 0x15a   : > { %2418 = vmatprep.subr.msk.mxu1 %vm310_vm1, %v305_v20 }
 0x15b   : > { %v295_v25 = vpop.permute.xlu1 %294  ;;  %v301_v26 = vpop.permute.xlu0 %300 }
 0x15d   : > { %2419 = vmatpush3.xpose.msk.msra.mxu1 %vm310_vm1, %v305_v20 }
 0x15e   : > { %2420 = vmatprep.subr.msk.mxu1 %vm310_vm1, %v303_v21 }
 0x15f   : > { %v560_v27 = vpop.permute.xlu1 %559  ;;  %v297_v28 = vpop.permute.xlu0 %296 }
 0x160   : > { %2442 = vmatprep.subr.mxu0 %v560_v27 }
 0x161   : > { %2421 = vmatpush3.xpose.msk.msra.mxu1 %vm310_vm1, %v303_v21  ;;  %2443 = vmatpush3.msra.mxu0 %v560_v27 }
 0x162   : > { %2422 = vmatprep.subr.msk.mxu1 %vm310_vm1, %v301_v26 }
 0x163   : > { %v552_v29 = vpop.permute.xlu0 %551  ;;  %v556_v31 = vpop.permute.xlu1 %555 }
 0x165   : > { %2423 = vmatpush3.xpose.msk.msra.mxu1 %vm310_vm1, %v301_v26 }
 0x166   : > { %2424 = vmatprep.subr.msk.mxu1 %vm310_vm1, %v299_v23 }
 0x167   : > { %v548_v30 = vpop.permute.xlu0 %547  ;;  %v554_v33 = vpop.permute.xlu1 %553 }
 0x169   : > { %2425 = vmatpush3.xpose.msk.msra.mxu1 %vm310_vm1, %v299_v23 }
 0x16a   : > { %2426 = vmatprep.subr.msk.mxu1 %vm310_vm1, %v297_v28 }
 0x16b   : > { %v2912_v32 = vpop.permute.xlu0 %728  ;;  %v550_v35 = vpop.permute.xlu1 %549 }
 0x16d   : > { %2427 = vmatpush3.xpose.msk.msra.mxu1 %vm310_vm1, %v297_v28 }
 0x16e   : > { %2428 = vmatprep.subr.msk.mxu1 %vm310_vm1, %v295_v25 }
 0x16f   : > { %v558_v34 = vpop.permute.xlu0 %557  ;;  %v546_v36 = vpop.permute.xlu1 %545 }
 0x170   : > { %2444 = vmatprep.subr.mxu0 %v558_v34 }
 0x171   : > { %2429 = vmatpush3.xpose.msk.msra.mxu1 %vm310_vm1, %v295_v25  ;;  %2445 = vmatpush3.msra.mxu0 %v558_v34 }
 0x172   : > { %2446 = vmatprep.subr.mxu0 %v556_v31 }
 0x173   : > { %2447 = vmatpush3.msra.mxu0 %v556_v31  ;;  %v2945_v61 = vpop.permute.xlu1 %726 }
 0x174   : > { %2431 = vmatmul.mubr.msk.f32.vlgmr.msra.gmra.mxu1 %vm310_vm1, %v2861_v12  ;;  %2448 = vmatprep.subr.mxu0 %v554_v33 }
 0x175   : > { %2433 = vmatprep.mubr.msk.f32.mxu1 %vm310_vm1, %v2869_v15  ;;  %2449 = vmatpush3.msra.mxu0 %v554_v33 }
 0x176   : > { %2450 = vmatprep.subr.mxu0 %v552_v29 }
 0x177   : > { %2451 = vmatpush3.msra.mxu0 %v552_v29 }
 0x178   : > { %2434 = vmatmul.mubr.msk.f32.gmra.mxu1 %vm310_vm1, %v2867_v14  ;;  %2452 = vmatprep.subr.mxu0 %v550_v35 }
 0x179   : > { %2436 = vmatprep.mubr.msk.f32.mxu1 %vm310_vm1, %v2874_v17  ;;  %2453 = vmatpush3.msra.mxu0 %v550_v35 }
 0x17a   : > { %2454 = vmatprep.subr.mxu0 %v548_v30 }
 0x17b   : > { %2455 = vmatpush3.msra.mxu0 %v548_v30 }
 0x17c   : > { %2437 = vmatmul.mubr.msk.f32.gmra.mxu1 %vm310_vm1, %v2871_v16  ;;  %2456 = vmatprep.subr.mxu0 %v546_v36 }
 0x17d   : > { %2439 = vmatprep.mubr.msk.f32.mxu1 %vm310_vm1, %v2880_v19  ;;  %2457 = vmatpush3.msra.mxu0 %v546_v36 }
 0x17e   : > { %2470 = vmatprep.subr.msk.mxu0 %vm310_vm1, %v2912_v32 }
 0x180   : > { %2440 = vmatmul.mubr.msk.f32.gmra.mxu1 %vm310_vm1, %v2876_v18 }
 0x234   : > { %v2432_v37 = vpop.f32.mrf.mxu1 }
 0x235   : > { %v449_v38 = vmul.f32 0.35355338, %v2432_v37 }
 0x236   : > { %v409_v39 = vpop.f32.mrf.mxu1 }
 0x237   : > { %v448_v40 = vmul.f32 0.35355338, %v409_v39  ;;  %v460_v41 = vsel %vm456_vm2, %v449_v38, -inf }
 0x238   : > { %461 = vmax.xlane.f32.xlu1 %v460_v41  ;;  %v2435_v42 = vpop.f32.mrf.mxu1 }
 0x239   : > { %v451_v43 = vmul.f32 0.35355338, %v2435_v42  ;;  %v457_v44 = vsel %vm456_vm2, %v448_v40, -inf }
 0x23a   : > { %458 = vmax.xlane.f32.xlu0 %v457_v44  ;;  %v419_v45 = vpop.f32.mrf.mxu1 }
 0x23b   : > { %v450_v47 = vmul.f32 0.35355338, %v419_v45  ;;  %v466_v48 = vsel %vm456_vm2, %v451_v43, -inf }
 0x23c   : > { %v2438_v46 = vpop.f32.mrf.mxu1 }
 0x23d   : > { %v453_v52 = vmul.f32 0.35355338, %v2438_v46  ;;  %v463_v53 = vsel %vm456_vm2, %v450_v47, -inf }
 0x23e   : > { %467 = vmax.xlane.f32.xlu0 %v466_v48  ;;  %v429_v49 = vpop.f32.mrf.mxu1 }
 0x23f   : > { %v452_v50 = vmul.f32 0.35355338, %v429_v49  ;;  %v472_v58 = vsel %vm456_vm2, %v453_v52, -inf }
 0x240   : > { %v2441_v51 = vpop.f32.mrf.mxu1 }
 0x241   : > { %v469_v54 = vsel %vm456_vm2, %v452_v50, -inf  ;;  %v455_v57 = vmul.f32 0.35355338, %v2441_v51 }
 0x242   : > { %464 = vmax.xlane.f32.xlu0 %v463_v53  ;;  %470 = vmax.xlane.f32.xlu1 %v469_v54  ;;  %v439_v55 = vpop.f32.mrf.mxu1 }
 0x243   : > { %v454_v56 = vmul.f32 0.35355338, %v439_v55  ;;  %v478_v60 = vsel %vm456_vm2, %v455_v57, -inf }
 0x245   : > { %v475_v59 = vsel %vm456_vm2, %v454_v56, -inf }
 0x246   : > { %473 = vmax.xlane.f32.xlu0 %v472_v58  ;;  %476 = vmax.xlane.f32.xlu1 %v475_v59 }
 0x24a   : > { %479 = vmax.xlane.f32.xlu0 %v478_v60 }
 0x257   : > { %722 = vrot.lane.b32.xlu1 %v2874_v17, %s2798_s25 }
 0x260   : > { %724 = vrot.lane.b32.xlu0 %v2871_v16, %s2798_s25 }
 0x2c1   : > { %v462_v62 = vpop.xlane.xlu1 %461 }
 0x2c2   : > { %v482_v63 = vsub.f32 %v449_v38, %v462_v62 }
 0x2c3   : > { %v459_v0 = vpop.xlane.xlu0 %458 }
 0x2c4   : > { %v491_v1 = vmul.f32 1.442695, %v482_v63  ;;  %v481_v2 = vsub.f32 %v448_v40, %v459_v0 }
 0x2c6   : > { %2660 = vpow2.f32 %v491_v1  ;;  %v489_v3 = vmul.f32 1.442695, %v481_v2 }
 0x2c7   : > { %v468_v8 = vpop.xlane.xlu0 %467 }
 0x2c8   : > { %2662 = vpow2.f32 %v489_v3  ;;  %v484_v21 = vsub.f32 %v451_v43, %v468_v8 }
 0x2ca   : > { %v495_v25 = vmul.f32 1.442695, %v484_v21 }
 0x2cb   : > { %v465_v9 = vpop.xlane.xlu0 %464  ;;  %v471_v10 = vpop.xlane.xlu1 %470 }
 0x2cc   : > { %v483_v11 = vsub.f32 %v450_v47, %v465_v9  ;;  %v485_v22 = vsub.f32 %v452_v50, %v471_v10 }
 0x2ce   : > { %v493_v23 = vmul.f32 1.442695, %v483_v11  ;;  %v497_v28 = vmul.f32 1.442695, %v485_v22 }
 0x2cf   : > { %v474_v20 = vpop.xlane.xlu0 %473  ;;  %v477_v24 = vpop.xlane.xlu1 %476 }
 0x2d0   : > { %v486_v26 = vsub.f32 %v453_v52, %v474_v20  ;;  %2664 = vpow2.f32 %v493_v23  ;;  %v487_v29 = vsub.f32 %v454_v56, %v477_v24 }
 0x2d1   : > { %2666 = vpow2.f32 %v495_v25 }
 0x2d2   : > { %v499_v30 = vmul.f32 1.442695, %v486_v26  ;;  %2668 = vpow2.f32 %v497_v28  ;;  %v501_v33 = vmul.f32 1.442695, %v487_v29 }
 0x2d3   : > { %v2947_v4 = vpop.eup %2660  ;;  %v480_v27 = vpop.xlane.xlu0 %479 }
 0x2d4   : > { %v508_v5 = vsel %vm456_vm2, %v2947_v4, 0.0  ;;  %v488_v31 = vsub.f32 %v455_v57, %v480_v27  ;;  %2670 = vpow2.f32 %v499_v30  ;;  %v723_v48 = vpop.permute.xlu1 %722 }
 0x2d5   : > { %v2951_v6 = vpop.eup %2662  ;;  %509 = vadd.xlane.f32.xlu0 %v508_v5  ;;  %2672 = vpow2.f32 %v501_v33 }
 0x2d6   : > { %v505_v7 = vsel %vm456_vm2, %v2951_v6, 0.0  ;;  %v503_v34 = vmul.f32 1.442695, %v488_v31 }
 0x2d7   : > { %506 = vadd.xlane.f32.xlu1 %v505_v7  ;;  %v725_v47 = vpop.permute.xlu0 %724 }
 0x2d8   : > { %2674 = vpow2.f32 %v503_v34 }
 0x2dd   : > { %v2959_v35 = vpop.eup %2664 }
 0x2de   : > { %v2961_v36 = vpop.eup %2666  ;;  %v511_v37 = vsel %vm456_vm2, %v2959_v35, 0.0 }
 0x2df   : > { %v2965_v38 = vpop.eup %2668  ;;  %v514_v39 = vsel %vm456_vm2, %v2961_v36, 0.0 }
 0x2e0   : > { %v517_v41 = vsel %vm456_vm2, %v2965_v38, 0.0 }
 0x2e1   : > { %v2969_v40 = vpop.eup %2670 }
 0x2e2   : > { %v2973_v42 = vpop.eup %2672  ;;  %v520_v43 = vsel %vm456_vm2, %v2969_v40, 0.0 }
 0x2e3   : > { %v523_v45 = vsel %vm456_vm2, %v2973_v42, 0.0 }
 0x2e5   : > { %v2977_v44 = vpop.eup %2674 }
 0x2e6   : > { %v526_v46 = vsel %vm456_vm2, %v2977_v44, 0.0 }
 0x2e8   : > { %718 = vrot.lane.b32.xlu1 %v2869_v15, %s2798_s25 }
 0x2eb   : > { %720 = vrot.lane.b32.xlu0 %v2867_v14, %s2798_s25 }
 0x30a   : > { %512 = vadd.xlane.f32.xlu0 %v511_v37 }
 0x30c   : > { %515 = vadd.xlane.f32.xlu1 %v514_v39 }
 0x30e   : > { %518 = vadd.xlane.f32.xlu0 %v517_v41 }
 0x310   : > { %521 = vadd.xlane.f32.xlu1 %v520_v43 }
 0x312   : > { %524 = vadd.xlane.f32.xlu0 %v523_v45 }
 0x314   : > { %527 = vadd.xlane.f32.xlu1 %v526_v46 }
 0x325   : > { %714 = vrot.lane.b32.xlu1 %v2863_v13, %s2798_s25 }
 0x328   : > { %716 = vrot.lane.b32.xlu0 %v2861_v12, %s2798_s25 }
 0x329   : > { %700 = vrot.lane.b32.xlu1 %v2861_v12, %s2799_s26 }
 0x32c   : > { %698 = vrot.lane.b32.xlu0 %v2863_v13, %s2799_s26 }
 0x32d   : > { %704 = vrot.lane.b32.xlu1 %v2867_v14, %s2799_s26 }
 0x330   : > { %702 = vrot.lane.b32.xlu0 %v2869_v15, %s2799_s26 }
 0x331   : > { %708 = vrot.lane.b32.xlu1 %v2871_v16, %s2799_s26 }
 0x334   : > { %706 = vrot.lane.b32.xlu0 %v2874_v17, %s2799_s26 }
 0x335   : > { %712 = vrot.lane.b32.xlu1 %v2876_v18, %s2799_s26 }
 0x338   : > { %710 = vrot.lane.b32.xlu0 %v2880_v19, %s2799_s26 }
 0x339   : > { %977 = vrot.lane.b32.xlu1 %v2876_v18, %s2800_s27 }
 0x33c   : > { %975 = vrot.lane.b32.xlu0 %v2880_v19, %s2800_s27 }
 0x33d   : > { %973 = vrot.lane.b32.xlu1 %v2871_v16, %s2800_s27 }
 0x340   : > { %969 = vrot.lane.b32.xlu0 %v2867_v14, %s2800_s27 }
 0x341   : > { %971 = vrot.lane.b32.xlu1 %v2874_v17, %s2800_s27 }
 0x344   : > { %965 = vrot.lane.b32.xlu0 %v2861_v12, %s2800_s27 }
 0x345   : > { %967 = vrot.lane.b32.xlu1 %v2869_v15, %s2800_s27 }
 0x348   : > { %1146 = vrot.lane.b32.xlu0 %v2876_v18, %s2801_s28 }
 0x349   : > { %963 = vrot.lane.b32.xlu1 %v2863_v13, %s2800_s27 }
 0x34d   : > { %1144 = vrot.lane.b32.xlu1 %v2880_v19, %s2801_s28 }
 0x35e   : > { %v510_v49 = vpop.xlane.xlu0 %509 }
 0x35f   : > { %2676 = vrcp.f32 %v510_v49 }
 0x360   : > { %v507_v50 = vpop.xlane.xlu1 %506 }
 0x361   : > { %2678 = vrcp.f32 %v507_v50 }
 0x362   : > { %v721_v55 = vpop.permute.xlu0 %720 }
 0x364   : > { %v719_v56 = vpop.permute.xlu1 %718 }
 0x36c   : > { %v2677_v51 = vpop.eup %2676 }
 0x36d   : > { %v538_v54 = vmul.f32 %v2677_v51, %v2947_v4 }
 0x36e   : > { %v2679_v52 = vpop.eup %2678 }
 0x36f   : > { %v537_v53 = vmul.f32 %v2679_v52, %v2951_v6 }
 0x371   : > { %2458 = vmatprep.mubr.msk.f32.mxu0 %vm456_vm2, %v537_v53 }
 0x372   : > { %2459 = vmatmul.mubr.msk.f32.vlgmr.msra.gmra.mxu0 %vm456_vm2, %v538_v54 }
 0x373   : > { %2471 = vmatpush3.xpose.msk.msra.mxu0 %vm310_vm1, %v2912_v32 }
 0x374   : > { %2472 = vmatprep.subr.msk.mxu0 %vm310_vm1, %v2945_v61 }
 0x377   : > { %2473 = vmatpush3.xpose.msk.msra.mxu0 %vm310_vm1, %v2945_v61 }
 0x378   : > { %2474 = vmatprep.subr.msk.mxu0 %vm310_vm1, %v725_v47 }
 0x37b   : > { %2475 = vmatpush3.xpose.msk.msra.mxu0 %vm310_vm1, %v725_v47 }
 0x37c   : > { %2476 = vmatprep.subr.msk.mxu0 %vm310_vm1, %v723_v48 }
 0x37f   : > { %2477 = vmatpush3.xpose.msk.msra.mxu0 %vm310_vm1, %v723_v48 }
 0x380   : > { %2478 = vmatprep.subr.msk.mxu0 %vm310_vm1, %v721_v55 }
 0x383   : > { %2479 = vmatpush3.xpose.msk.msra.mxu0 %vm310_vm1, %v721_v55 }
 0x384   : > { %2480 = vmatprep.subr.msk.mxu0 %vm310_vm1, %v719_v56 }
 0x387   : > { %2481 = vmatpush3.xpose.msk.msra.mxu0 %vm310_vm1, %v719_v56 }
 0x393   : > { %v513_v32 = vpop.xlane.xlu0 %512 }
 0x394   : > { %2680 = vrcp.f32 %v513_v32 }
 0x395   : > { %v516_v57 = vpop.xlane.xlu1 %515 }
 0x396   : > { %2682 = vrcp.f32 %v516_v57 }
 0x397   : > { %v519_v58 = vpop.xlane.xlu0 %518 }
 0x398   : > { %2684 = vrcp.f32 %v519_v58 }
 0x399   : > { %v522_v59 = vpop.xlane.xlu1 %521 }
 0x39a   : > { %2686 = vrcp.f32 %v522_v59 }
 0x39b   : > { %v525_v60 = vpop.xlane.xlu0 %524 }
 0x39c   : > { %2688 = vrcp.f32 %v525_v60 }
 0x39d   : > { %v528_v61 = vpop.xlane.xlu1 %527 }
 0x39e   : > { %2690 = vrcp.f32 %v528_v61 }
 0x39f   : > { %v717_v62 = vpop.permute.xlu0 %716 }
 0x3a0   : > { %2482 = vmatprep.subr.msk.mxu0 %vm310_vm1, %v717_v62 }
 0x3a1   : > { %v2681_v63 = vpop.eup %2680  ;;  %v715_v0 = vpop.permute.xlu1 %714  ;;  %2483 = vmatpush3.xpose.msk.msra.mxu0 %vm310_vm1, %v717_v62 }
 0x3a2   : > { %2484 = vmatprep.subr.msk.mxu0 %vm310_vm1, %v715_v0  ;;  %v539_v1 = vmul.f32 %v2681_v63, %v2959_v35 }
 0x3a3   : > { %v2683_v2 = vpop.eup %2682  ;;  %v699_v3 = vpop.permute.xlu0 %698 }
 0x3a4   : > { %2461 = vmatprep.mubr.msk.f32.mxu0 %vm456_vm2, %v539_v1  ;;  %v540_v4 = vmul.f32 %v2683_v2, %v2961_v36 }
 0x3a5   : > { %v2685_v5 = vpop.eup %2684  ;;  %v701_v6 = vpop.permute.xlu1 %700  ;;  %2485 = vmatpush3.xpose.msk.msra.mxu0 %vm310_vm1, %v715_v0 }
 0x3a6   : > { %2462 = vmatmul.mubr.msk.f32.gmra.mxu0 %vm456_vm2, %v540_v4  ;;  %v541_v7 = vmul.f32 %v2685_v5, %v2965_v38 }
 0x3a7   : > { %v2687_v8 = vpop.eup %2686  ;;  %v703_v9 = vpop.permute.xlu0 %702 }
 0x3a8   : > { %2464 = vmatprep.mubr.msk.f32.mxu0 %vm456_vm2, %v541_v7  ;;  %v542_v10 = vmul.f32 %v2687_v8, %v2969_v40 }
 0x3a9   : > { %v2689_v11 = vpop.eup %2688  ;;  %v705_v20 = vpop.permute.xlu1 %704 }
 0x3aa   : > { %2465 = vmatmul.mubr.msk.f32.gmra.mxu0 %vm456_vm2, %v542_v10  ;;  %v543_v21 = vmul.f32 %v2689_v11, %v2973_v42 }
 0x3ab   : > { %v2691_v22 = vpop.eup %2690  ;;  %v707_v23 = vpop.permute.xlu0 %706 }
 0x3ac   : > { %2467 = vmatprep.mubr.msk.f32.mxu0 %vm456_vm2, %v543_v21  ;;  %v544_v24 = vmul.f32 %v2691_v22, %v2977_v44 }
 0x3ad   : > { %v709_v25 = vpop.permute.xlu1 %708 }
 0x3ae   : > { %2468 = vmatmul.mubr.msk.f32.gmra.mxu0 %vm456_vm2, %v544_v24 }
 0x3af   : > { %2486 = vmatprep.mubr.msk.f32.mxu0 %vm310_vm1, %v699_v3  ;;  %v711_v26 = vpop.permute.xlu0 %710 }
 0x3b1   : > { %v713_v27 = vpop.permute.xlu1 %712 }
 0x3b2   : > { %2487 = vmatmul.mubr.msk.f32.vlgmr.msra.gmra.mxu0 %vm310_vm1, %v701_v6 }
 0x3b3   : > { %2489 = vmatprep.mubr.msk.f32.mxu0 %vm310_vm1, %v703_v9  ;;  %v976_v28 = vpop.permute.xlu0 %975 }
 0x3b5   : > { %v978_v29 = vpop.permute.xlu1 %977 }
 0x3b6   : > { %2490 = vmatmul.mubr.msk.f32.gmra.mxu0 %vm310_vm1, %v705_v20  ;;  %2498 = vmatprep.subr.mxu1 %v978_v29 }
 0x3b7   : > { %2492 = vmatprep.mubr.msk.f32.mxu0 %vm310_vm1, %v707_v23  ;;  %2499 = vmatpush3.msra.mxu1 %v978_v29  ;;  %v970_v31 = vpop.permute.xlu0 %969 }
 0x3b8   : > { %2500 = vmatprep.subr.mxu1 %v976_v28 }
 0x3b9   : > { %v974_v30 = vpop.permute.xlu1 %973  ;;  %2501 = vmatpush3.msra.mxu1 %v976_v28 }
 0x3ba   : > { %2493 = vmatmul.mubr.msk.f32.gmra.mxu0 %vm310_vm1, %v709_v25  ;;  %2502 = vmatprep.subr.mxu1 %v974_v30 }
 0x3bb   : > { %2495 = vmatprep.mubr.msk.f32.mxu0 %vm310_vm1, %v711_v26  ;;  %2503 = vmatpush3.msra.mxu1 %v974_v30  ;;  %v966_v34 = vpop.permute.xlu0 %965 }
 0x3bd   : > { %v972_v33 = vpop.permute.xlu1 %971 }
 0x3be   : > { %2496 = vmatmul.mubr.msk.f32.gmra.mxu0 %vm310_vm1, %v713_v27  ;;  %2504 = vmatprep.subr.mxu1 %v972_v33 }
 0x3bf   : > { %2505 = vmatpush3.msra.mxu1 %v972_v33  ;;  %v3049_v37 = vpop.permute.xlu0 %1146 }
 0x3c0   : > { %2506 = vmatprep.subr.mxu1 %v970_v31 }
 0x3c1   : > { %v968_v35 = vpop.permute.xlu1 %967  ;;  %2507 = vmatpush3.msra.mxu1 %v970_v31 }
 0x3c2   : > { %2508 = vmatprep.subr.mxu1 %v968_v35 }
 0x3c3   : > { %2509 = vmatpush3.msra.mxu1 %v968_v35 }
 0x3c4   : > { %2510 = vmatprep.subr.mxu1 %v966_v34 }
 0x3c5   : > { %v964_v36 = vpop.permute.xlu1 %963  ;;  %2511 = vmatpush3.msra.mxu1 %v966_v34 }
 0x3c6   : > { %2512 = vmatprep.subr.mxu1 %v964_v36 }
 0x3c7   : > { %2513 = vmatpush3.msra.mxu1 %v964_v36 }
 0x3c8   : > { %2526 = vmatprep.subr.msk.mxu1 %vm310_vm1, %v3049_v37 }
 0x3c9   : > { %v3081_v5 = vpop.permute.xlu1 %1144 }
 0x432   : > { %v3053_v38 = vpop.f32.mrf.mxu0 }
 0x434   : > { %v3055_v39 = vpop.f32.mrf.mxu0 }
 0x466   : > { %v3057_v40 = vpop.f32.mrf.mxu0 }
 0x468   : > { %v3059_v41 = vpop.f32.mrf.mxu0 }
 0x46a   : > { %v3061_v42 = vpop.f32.mrf.mxu0 }
 0x46c   : > { %v3063_v43 = vpop.f32.mrf.mxu0 }
 0x46e   : > { %v3065_v44 = vpop.f32.mrf.mxu0 }
 0x470   : > { %v3067_v45 = vpop.f32.mrf.mxu0 }
 0x472   : > { %v2488_v46 = vpop.f32.mrf.mxu0 }
 0x473   : > { %v868_v47 = vmul.f32 0.35355338, %v2488_v46 }
 0x474   : > { %v828_v48 = vpop.f32.mrf.mxu0 }
 0x475   : > { %v867_v49 = vmul.f32 0.35355338, %v828_v48  ;;  %v878_v50 = vsel %vm456_vm2, %v868_v47, -inf }
 0x476   : > { %879 = vmax.xlane.f32.xlu1 %v878_v50  ;;  %v2491_v51 = vpop.f32.mrf.mxu0 }
 0x477   : > { %v870_v52 = vmul.f32 0.35355338, %v2491_v51  ;;  %v875_v53 = vsel %vm456_vm2, %v867_v49, -inf }
 0x478   : > { %876 = vmax.xlane.f32.xlu0 %v875_v53  ;;  %v838_v54 = vpop.f32.mrf.mxu0 }
 0x479   : > { %v869_v56 = vmul.f32 0.35355338, %v838_v54  ;;  %v884_v32 = vsel %vm456_vm2, %v870_v52, -inf }
 0x47a   : > { %v2494_v55 = vpop.f32.mrf.mxu0 }
 0x47b   : > { %v872_v60 = vmul.f32 0.35355338, %v2494_v55  ;;  %v881_v61 = vsel %vm456_vm2, %v869_v56, -inf }
 0x47c   : > { %885 = vmax.xlane.f32.xlu0 %v884_v32  ;;  %v848_v57 = vpop.f32.mrf.mxu0 }
 0x47d   : > { %v871_v58 = vmul.f32 0.35355338, %v848_v57  ;;  %v890_v2 = vsel %vm456_vm2, %v872_v60, -inf }
 0x47e   : > { %v2497_v59 = vpop.f32.mrf.mxu0 }
 0x47f   : > { %v887_v62 = vsel %vm456_vm2, %v871_v58, -inf  ;;  %v874_v1 = vmul.f32 0.35355338, %v2497_v59 }
 0x480   : > { %882 = vmax.xlane.f32.xlu0 %v881_v61  ;;  %888 = vmax.xlane.f32.xlu1 %v887_v62  ;;  %v858_v63 = vpop.f32.mrf.mxu0 }
 0x481   : > { %v873_v0 = vmul.f32 0.35355338, %v858_v63  ;;  %v896_v4 = vsel %vm456_vm2, %v874_v1, -inf }
 0x483   : > { %v893_v3 = vsel %vm456_vm2, %v873_v0, -inf }
 0x484   : > { %891 = vmax.xlane.f32.xlu0 %v890_v2  ;;  %894 = vmax.xlane.f32.xlu1 %v893_v3 }
 0x488   : > { %897 = vmax.xlane.f32.xlu0 %v896_v4 }
 0x495   : > { %1140 = vrot.lane.b32.xlu1 %v2874_v17, %s2801_s28 }
 0x49e   : > { %1142 = vrot.lane.b32.xlu0 %v2871_v16, %s2801_s28 }
 0x4ff   : > { %v880_v6 = vpop.xlane.xlu1 %879 }
 0x500   : > { %v900_v7 = vsub.f32 %v868_v47, %v880_v6 }
 0x501   : > { %v877_v8 = vpop.xlane.xlu0 %876 }
 0x502   : > { %v909_v9 = vmul.f32 1.442695, %v900_v7  ;;  %v899_v10 = vsub.f32 %v867_v49, %v877_v8 }
 0x504   : > { %2692 = vpow2.f32 %v909_v9  ;;  %v907_v11 = vmul.f32 1.442695, %v899_v10 }
 0x505   : > { %v886_v24 = vpop.xlane.xlu0 %885 }
 0x506   : > { %2694 = vpow2.f32 %v907_v11  ;;  %v902_v29 = vsub.f32 %v870_v52, %v886_v24 }
 0x508   : > { %v913_v34 = vmul.f32 1.442695, %v902_v29 }
 0x509   : > { %v883_v25 = vpop.xlane.xlu0 %882  ;;  %v889_v26 = vpop.xlane.xlu1 %888 }
 0x50a   : > { %v901_v27 = vsub.f32 %v869_v56, %v883_v25  ;;  %v903_v30 = vsub.f32 %v871_v58, %v889_v26 }
 0x50c   : > { %v911_v31 = vmul.f32 1.442695, %v901_v27  ;;  %v915_v46 = vmul.f32 1.442695, %v903_v30 }
 0x50d   : > { %v892_v28 = vpop.xlane.xlu0 %891  ;;  %v895_v33 = vpop.xlane.xlu1 %894 }
 0x50e   : > { %v904_v35 = vsub.f32 %v872_v60, %v892_v28  ;;  %2696 = vpow2.f32 %v911_v31  ;;  %v905_v47 = vsub.f32 %v873_v0, %v895_v33 }
 0x50f   : > { %2698 = vpow2.f32 %v913_v34 }
 0x510   : > { %v917_v48 = vmul.f32 1.442695, %v904_v35  ;;  %2700 = vpow2.f32 %v915_v46  ;;  %v919_v50 = vmul.f32 1.442695, %v905_v47 }
 0x511   : > { %v3083_v20 = vpop.eup %2692  ;;  %v898_v36 = vpop.xlane.xlu0 %897 }
 0x512   : > { %v926_v21 = vsel %vm456_vm2, %v3083_v20, 0.0  ;;  %v906_v49 = vsub.f32 %v874_v1, %v898_v36  ;;  %2702 = vpow2.f32 %v917_v48  ;;  %v1141_v0 = vpop.permute.xlu1 %1140 }
 0x513   : > { %v3087_v22 = vpop.eup %2694  ;;  %927 = vadd.xlane.f32.xlu0 %v926_v21  ;;  %2704 = vpow2.f32 %v919_v50 }
 0x514   : > { %v923_v23 = vsel %vm456_vm2, %v3087_v22, 0.0  ;;  %v921_v51 = vmul.f32 1.442695, %v906_v49 }
 0x515   : > { %924 = vadd.xlane.f32.xlu1 %v923_v23  ;;  %v1143_v63 = vpop.permute.xlu0 %1142 }
 0x516   : > { %2706 = vpow2.f32 %v921_v51 }
 0x51b   : > { %v3095_v53 = vpop.eup %2696 }
 0x51c   : > { %v3097_v52 = vpop.eup %2698  ;;  %v929_v54 = vsel %vm456_vm2, %v3095_v53, 0.0 }
 0x51d   : > { %v3101_v55 = vpop.eup %2700  ;;  %v932_v56 = vsel %vm456_vm2, %v3097_v52, 0.0 }
 0x51e   : > { %v935_v57 = vsel %vm456_vm2, %v3101_v55, 0.0 }
 0x51f   : > { %v3105_v32 = vpop.eup %2702 }
 0x520   : > { %v3109_v58 = vpop.eup %2704  ;;  %v938_v59 = vsel %vm456_vm2, %v3105_v32, 0.0 }
 0x521   : > { %v941_v61 = vsel %vm456_vm2, %v3109_v58, 0.0 }
 0x523   : > { %v3113_v60 = vpop.eup %2706 }
 0x524   : > { %v944_v62 = vsel %vm456_vm2, %v3113_v60, 0.0 }
 0x526   : > { %1136 = vrot.lane.b32.xlu1 %v2869_v15, %s2801_s28 }
 0x529   : > { %1138 = vrot.lane.b32.xlu0 %v2867_v14, %s2801_s28 }
 0x548   : > { %930 = vadd.xlane.f32.xlu0 %v929_v54 }
 0x54a   : > { %933 = vadd.xlane.f32.xlu1 %v932_v56 }
 0x54c   : > { %936 = vadd.xlane.f32.xlu0 %v935_v57 }
 0x54e   : > { %939 = vadd.xlane.f32.xlu1 %v938_v59 }
 0x550   : > { %942 = vadd.xlane.f32.xlu0 %v941_v61 }
 0x552   : > { %945 = vadd.xlane.f32.xlu1 %v944_v62 }
 0x563   : > { %1132 = vrot.lane.b32.xlu1 %v2863_v13, %s2801_s28 }
 0x566   : > { %1134 = vrot.lane.b32.xlu0 %v2861_v12, %s2801_s28 }
 0x567   : > { %1118 = vrot.lane.b32.xlu1 %v2861_v12, %s2802_s29 }
 0x56a   : > { %1116 = vrot.lane.b32.xlu0 %v2863_v13, %s2802_s29 }
 0x56b   : > { %1122 = vrot.lane.b32.xlu1 %v2867_v14, %s2802_s29 }
 0x56e   : > { %1120 = vrot.lane.b32.xlu0 %v2869_v15, %s2802_s29 }
 0x56f   : > { %1126 = vrot.lane.b32.xlu1 %v2871_v16, %s2802_s29 }
 0x572   : > { %1124 = vrot.lane.b32.xlu0 %v2874_v17, %s2802_s29 }
 0x573   : > { %1130 = vrot.lane.b32.xlu1 %v2876_v18, %s2802_s29 }
 0x576   : > { %1128 = vrot.lane.b32.xlu0 %v2880_v19, %s2802_s29 }
 0x577   : > { %1395 = vrot.lane.b32.xlu1 %v2876_v18, %s2803_s30 }
 0x57a   : > { %1393 = vrot.lane.b32.xlu0 %v2880_v19, %s2803_s30 }
 0x57b   : > { %1391 = vrot.lane.b32.xlu1 %v2871_v16, %s2803_s30 }
 0x57e   : > { %1387 = vrot.lane.b32.xlu0 %v2867_v14, %s2803_s30 }
 0x57f   : > { %1389 = vrot.lane.b32.xlu1 %v2874_v17, %s2803_s30 }
 0x582   : > { %1383 = vrot.lane.b32.xlu0 %v2861_v12, %s2803_s30 }
 0x583   : > { %1385 = vrot.lane.b32.xlu1 %v2869_v15, %s2803_s30 }
 0x586   : > { %1564 = vrot.lane.b32.xlu0 %v2876_v18, %s2804_s3 }
 0x587   : > { %1381 = vrot.lane.b32.xlu1 %v2863_v13, %s2803_s30 }
 0x58b   : > { %1562 = vrot.lane.b32.xlu1 %v2880_v19, %s2804_s3 }
 0x59c   : > { %v928_v1 = vpop.xlane.xlu0 %927 }
 0x59d   : > { %2708 = vrcp.f32 %v928_v1 }
 0x59e   : > { %v925_v2 = vpop.xlane.xlu1 %924 }
 0x59f   : > { %2710 = vrcp.f32 %v925_v2 }
 0x5a0   : > { %v1139_v8 = vpop.permute.xlu0 %1138 }
 0x5a2   : > { %v1137_v9 = vpop.permute.xlu1 %1136 }
 0x5aa   : > { %v2709_v3 = vpop.eup %2708 }
 0x5ab   : > { %v956_v7 = vmul.f32 %v2709_v3, %v3083_v20 }
 0x5ac   : > { %v2711_v4 = vpop.eup %2710 }
 0x5ad   : > { %v955_v6 = vmul.f32 %v2711_v4, %v3087_v22 }
 0x5af   : > { %2514 = vmatprep.mubr.msk.f32.mxu1 %vm456_vm2, %v955_v6 }
 0x5b0   : > { %2515 = vmatmul.mubr.msk.f32.vlgmr.msra.gmra.mxu1 %vm456_vm2, %v956_v7 }
 0x5b1   : > { %2527 = vmatpush3.xpose.msk.msra.mxu1 %vm310_vm1, %v3049_v37 }
 0x5b2   : > { %2528 = vmatprep.subr.msk.mxu1 %vm310_vm1, %v3081_v5 }
 0x5b5   : > { %2529 = vmatpush3.xpose.msk.msra.mxu1 %vm310_vm1, %v3081_v5 }
 0x5b6   : > { %2530 = vmatprep.subr.msk.mxu1 %vm310_vm1, %v1143_v63 }
 0x5b9   : > { %2531 = vmatpush3.xpose.msk.msra.mxu1 %vm310_vm1, %v1143_v63 }
 0x5ba   : > { %2532 = vmatprep.subr.msk.mxu1 %vm310_vm1, %v1141_v0 }
 0x5bd   : > { %2533 = vmatpush3.xpose.msk.msra.mxu1 %vm310_vm1, %v1141_v0 }
 0x5be   : > { %2534 = vmatprep.subr.msk.mxu1 %vm310_vm1, %v1139_v8 }
 0x5c1   : > { %2535 = vmatpush3.xpose.msk.msra.mxu1 %vm310_vm1, %v1139_v8 }
 0x5c2   : > { %2536 = vmatprep.subr.msk.mxu1 %vm310_vm1, %v1137_v9 }
 0x5c5   : > { %2537 = vmatpush3.xpose.msk.msra.mxu1 %vm310_vm1, %v1137_v9 }
 0x5d1   : > { %v931_v37 = vpop.xlane.xlu0 %930 }
 0x5d2   : > { %2712 = vrcp.f32 %v931_v37 }
 0x5d3   : > { %v934_v5 = vpop.xlane.xlu1 %933 }
 0x5d4   : > { %2714 = vrcp.f32 %v934_v5 }
 0x5d5   : > { %v937_v10 = vpop.xlane.xlu0 %936 }
 0x5d6   : > { %2716 = vrcp.f32 %v937_v10 }
 0x5d7   : > { %v940_v11 = vpop.xlane.xlu1 %939 }
 0x5d8   : > { %2718 = vrcp.f32 %v940_v11 }
 0x5d9   : > { %v943_v20 = vpop.xlane.xlu0 %942 }
 0x5da   : > { %2720 = vrcp.f32 %v943_v20 }
 0x5db   : > { %v946_v21 = vpop.xlane.xlu1 %945 }
 0x5dc   : > { %2722 = vrcp.f32 %v946_v21 }
 0x5dd   : > { %v1135_v22 = vpop.permute.xlu0 %1134 }
 0x5de   : > { %2538 = vmatprep.subr.msk.mxu1 %vm310_vm1, %v1135_v22 }
 0x5df   : > { %v2713_v23 = vpop.eup %2712  ;;  %v1133_v24 = vpop.permute.xlu1 %1132  ;;  %2539 = vmatpush3.xpose.msk.msra.mxu1 %vm310_vm1, %v1135_v22 }
 0x5e0   : > { %2540 = vmatprep.subr.msk.mxu1 %vm310_vm1, %v1133_v24  ;;  %v957_v25 = vmul.f32 %v2713_v23, %v3095_v53 }
 0x5e1   : > { %v2715_v26 = vpop.eup %2714  ;;  %v1117_v27 = vpop.permute.xlu0 %1116 }
 0x5e2   : > { %2517 = vmatprep.mubr.msk.f32.mxu1 %vm456_vm2, %v957_v25  ;;  %v958_v28 = vmul.f32 %v2715_v26, %v3097_v52 }
 0x5e3   : > { %v2717_v29 = vpop.eup %2716  ;;  %v1119_v30 = vpop.permute.xlu1 %1118  ;;  %2541 = vmatpush3.xpose.msk.msra.mxu1 %vm310_vm1, %v1133_v24 }
 0x5e4   : > { %2518 = vmatmul.mubr.msk.f32.gmra.mxu1 %vm456_vm2, %v958_v28  ;;  %v959_v31 = vmul.f32 %v2717_v29, %v3101_v55 }
 0x5e5   : > { %v2719_v33 = vpop.eup %2718  ;;  %v1121_v34 = vpop.permute.xlu0 %1120 }
 0x5e6   : > { %2520 = vmatprep.mubr.msk.f32.mxu1 %vm456_vm2, %v959_v31  ;;  %v960_v35 = vmul.f32 %v2719_v33, %v3105_v32 }
 0x5e7   : > { %v2721_v36 = vpop.eup %2720  ;;  %v1123_v46 = vpop.permute.xlu1 %1122 }
 0x5e8   : > { %2521 = vmatmul.mubr.msk.f32.gmra.mxu1 %vm456_vm2, %v960_v35  ;;  %v961_v47 = vmul.f32 %v2721_v36, %v3109_v58 }
 0x5e9   : > { %v2723_v48 = vpop.eup %2722  ;;  %v1125_v49 = vpop.permute.xlu0 %1124 }
 0x5ea   : > { %2523 = vmatprep.mubr.msk.f32.mxu1 %vm456_vm2, %v961_v47  ;;  %v962_v50 = vmul.f32 %v2723_v48, %v3113_v60 }
 0x5eb   : > { %v1127_v51 = vpop.permute.xlu1 %1126 }
 0x5ec   : > { %2524 = vmatmul.mubr.msk.f32.gmra.mxu1 %vm456_vm2, %v962_v50 }
 0x5ed   : > { %2542 = vmatprep.mubr.msk.f32.mxu1 %vm310_vm1, %v1117_v27  ;;  %v1129_v53 = vpop.permute.xlu0 %1128 }
 0x5ef   : > { %v1131_v52 = vpop.permute.xlu1 %1130 }
 0x5f0   : > { %2543 = vmatmul.mubr.msk.f32.vlgmr.msra.gmra.mxu1 %vm310_vm1, %v1119_v30 }
 0x5f1   : > { %2545 = vmatprep.mubr.msk.f32.mxu1 %vm310_vm1, %v1121_v34  ;;  %v1394_v54 = vpop.permute.xlu0 %1393 }
 0x5f3   : > { %v1396_v55 = vpop.permute.xlu1 %1395 }
 0x5f4   : > { %2546 = vmatmul.mubr.msk.f32.gmra.mxu1 %vm310_vm1, %v1123_v46  ;;  %2554 = vmatprep.subr.mxu0 %v1396_v55 }
 0x5f5   : > { %2548 = vmatprep.mubr.msk.f32.mxu1 %vm310_vm1, %v1125_v49  ;;  %2555 = vmatpush3.msra.mxu0 %v1396_v55  ;;  %v1388_v32 = vpop.permute.xlu0 %1387 }
 0x5f6   : > { %2556 = vmatprep.subr.mxu0 %v1394_v54 }
 0x5f7   : > { %v1392_v56 = vpop.permute.xlu1 %1391  ;;  %2557 = vmatpush3.msra.mxu0 %v1394_v54 }
 0x5f8   : > { %2549 = vmatmul.mubr.msk.f32.gmra.mxu1 %vm310_vm1, %v1127_v51  ;;  %2558 = vmatprep.subr.mxu0 %v1392_v56 }
 0x5f9   : > { %2551 = vmatprep.mubr.msk.f32.mxu1 %vm310_vm1, %v1129_v53  ;;  %2559 = vmatpush3.msra.mxu0 %v1392_v56  ;;  %v1384_v58 = vpop.permute.xlu0 %1383 }
 0x5fb   : > { %v1390_v57 = vpop.permute.xlu1 %1389 }
 0x5fc   : > { %2552 = vmatmul.mubr.msk.f32.gmra.mxu1 %vm310_vm1, %v1131_v52  ;;  %2560 = vmatprep.subr.mxu0 %v1390_v57 }
 0x5fd   : > { %2561 = vmatpush3.msra.mxu0 %v1390_v57  ;;  %v3185_v61 = vpop.permute.xlu0 %1564 }
 0x5fe   : > { %2562 = vmatprep.subr.mxu0 %v1388_v32 }
 0x5ff   : > { %v1386_v59 = vpop.permute.xlu1 %1385  ;;  %2563 = vmatpush3.msra.mxu0 %v1388_v32 }
 0x600   : > { %2564 = vmatprep.subr.mxu0 %v1386_v59 }
 0x601   : > { %2565 = vmatpush3.msra.mxu0 %v1386_v59 }
 0x602   : > { %2566 = vmatprep.subr.mxu0 %v1384_v58 }
 0x603   : > { %v1382_v60 = vpop.permute.xlu1 %1381  ;;  %2567 = vmatpush3.msra.mxu0 %v1384_v58 }
 0x604   : > { %2568 = vmatprep.subr.mxu0 %v1382_v60 }
 0x605   : > { %2569 = vmatpush3.msra.mxu0 %v1382_v60 }
 0x606   : > { %2582 = vmatprep.subr.msk.mxu0 %vm310_vm1, %v3185_v61 }
 0x607   : > { %v3217_v47 = vpop.permute.xlu1 %1562 }
 0x670   : > { %v3189_v62 = vpop.f32.mrf.mxu1 }
 0x672   : > { %v3191_v63 = vpop.f32.mrf.mxu1 }
 0x6a4   : > { %v3193_v0 = vpop.f32.mrf.mxu1 }
 0x6a6   : > { %v3195_v1 = vpop.f32.mrf.mxu1 }
 0x6a8   : > { %v3197_v2 = vpop.f32.mrf.mxu1 }
 0x6aa   : > { %v3199_v3 = vpop.f32.mrf.mxu1 }
 0x6ac   : > { %v3201_v4 = vpop.f32.mrf.mxu1 }
 0x6ae   : > { %v3203_v6 = vpop.f32.mrf.mxu1 }
 0x6b0   : > { %v2544_v7 = vpop.f32.mrf.mxu1 }
 0x6b1   : > { %v1286_v8 = vmul.f32 0.35355338, %v2544_v7 }
 0x6b2   : > { %v1246_v9 = vpop.f32.mrf.mxu1 }
 0x6b3   : > { %v1285_v37 = vmul.f32 0.35355338, %v1246_v9  ;;  %v1296_v5 = vsel %vm456_vm2, %v1286_v8, -inf }
 0x6b4   : > { %1297 = vmax.xlane.f32.xlu1 %v1296_v5  ;;  %v2547_v10 = vpop.f32.mrf.mxu1 }
 0x6b5   : > { %v1288_v11 = vmul.f32 0.35355338, %v2547_v10  ;;  %v1293_v20 = vsel %vm456_vm2, %v1285_v37, -inf }
 0x6b6   : > { %1294 = vmax.xlane.f32.xlu0 %v1293_v20  ;;  %v1256_v21 = vpop.f32.mrf.mxu1 }
 0x6b7   : > { %v1287_v23 = vmul.f32 0.35355338, %v1256_v21  ;;  %v1302_v24 = vsel %vm456_vm2, %v1288_v11, -inf }
 0x6b8   : > { %v2550_v22 = vpop.f32.mrf.mxu1 }
 0x6b9   : > { %v1290_v28 = vmul.f32 0.35355338, %v2550_v22  ;;  %v1299_v29 = vsel %vm456_vm2, %v1287_v23, -inf }
 0x6ba   : > { %1303 = vmax.xlane.f32.xlu0 %v1302_v24  ;;  %v1266_v25 = vpop.f32.mrf.mxu1 }
 0x6bb   : > { %v1289_v26 = vmul.f32 0.35355338, %v1266_v25  ;;  %v1308_v35 = vsel %vm456_vm2, %v1290_v28, -inf }
 0x6bc   : > { %v2553_v27 = vpop.f32.mrf.mxu1 }
 0x6bd   : > { %v1305_v30 = vsel %vm456_vm2, %v1289_v26, -inf  ;;  %v1292_v34 = vmul.f32 0.35355338, %v2553_v27 }
 0x6be   : > { %1300 = vmax.xlane.f32.xlu0 %v1299_v29  ;;  %1306 = vmax.xlane.f32.xlu1 %v1305_v30  ;;  %v1276_v31 = vpop.f32.mrf.mxu1 }
 0x6bf   : > { %v1291_v33 = vmul.f32 0.35355338, %v1276_v31  ;;  %v1314_v46 = vsel %vm456_vm2, %v1292_v34, -inf }
 0x6c1   : > { %v1311_v36 = vsel %vm456_vm2, %v1291_v33, -inf }
 0x6c2   : > { %1309 = vmax.xlane.f32.xlu0 %v1308_v35  ;;  %1312 = vmax.xlane.f32.xlu1 %v1311_v36 }
 0x6c6   : > { %1315 = vmax.xlane.f32.xlu0 %v1314_v46 }
 0x6d3   : > { %1558 = vrot.lane.b32.xlu1 %v2874_v17, %s2804_s3 }
 0x6dc   : > { %1560 = vrot.lane.b32.xlu0 %v2871_v16, %s2804_s3 }
 0x73d   : > { %v1298_v48 = vpop.xlane.xlu1 %1297 }
 0x73e   : > { %v1318_v49 = vsub.f32 %v1286_v8, %v1298_v48 }
 0x73f   : > { %v1295_v50 = vpop.xlane.xlu0 %1294 }
 0x740   : > { %v1327_v51 = vmul.f32 1.442695, %v1318_v49  ;;  %v1317_v53 = vsub.f32 %v1285_v37, %v1295_v50 }
 0x742   : > { %2724 = vpow2.f32 %v1327_v51  ;;  %v1325_v52 = vmul.f32 1.442695, %v1317_v53 }
 0x743   : > { %v1304_v57 = vpop.xlane.xlu0 %1303 }
 0x744   : > { %2726 = vpow2.f32 %v1325_v52  ;;  %v1320_v8 = vsub.f32 %v1288_v11, %v1304_v57 }
 0x746   : > { %v1331_v10 = vmul.f32 1.442695, %v1320_v8 }
 0x747   : > { %v1301_v58 = vpop.xlane.xlu0 %1300  ;;  %v1307_v59 = vpop.xlane.xlu1 %1306 }
 0x748   : > { %v1319_v60 = vsub.f32 %v1287_v23, %v1301_v58  ;;  %v1321_v9 = vsub.f32 %v1289_v26, %v1307_v59 }
 0x74a   : > { %v1329_v37 = vmul.f32 1.442695, %v1319_v60  ;;  %v1333_v22 = vmul.f32 1.442695, %v1321_v9 }
 0x74b   : > { %v1310_v7 = vpop.xlane.xlu0 %1309  ;;  %v1313_v5 = vpop.xlane.xlu1 %1312 }
 0x74c   : > { %v1322_v20 = vsub.f32 %v1290_v28, %v1310_v7  ;;  %2728 = vpow2.f32 %v1329_v37  ;;  %v1323_v24 = vsub.f32 %v1291_v33, %v1313_v5 }
 0x74d   : > { %2730 = vpow2.f32 %v1331_v10 }
 0x74e   : > { %v1335_v25 = vmul.f32 1.442695, %v1322_v20  ;;  %2732 = vpow2.f32 %v1333_v22  ;;  %v1337_v29 = vmul.f32 1.442695, %v1323_v24 }
 0x74f   : > { %v3219_v54 = vpop.eup %2724  ;;  %v1316_v21 = vpop.xlane.xlu0 %1315 }
 0x750   : > { %v1344_v55 = vsel %vm456_vm2, %v3219_v54, 0.0  ;;  %v1324_v27 = vsub.f32 %v1292_v34, %v1316_v21  ;;  %2734 = vpow2.f32 %v1335_v25  ;;  %v1559_v51 = vpop.permute.xlu1 %1558 }
 0x751   : > { %v3223_v56 = vpop.eup %2726  ;;  %1345 = vadd.xlane.f32.xlu0 %v1344_v55  ;;  %2736 = vpow2.f32 %v1337_v29 }
 0x752   : > { %v1341_v32 = vsel %vm456_vm2, %v3223_v56, 0.0  ;;  %v1339_v30 = vmul.f32 1.442695, %v1324_v27 }
 0x753   : > { %1342 = vadd.xlane.f32.xlu1 %v1341_v32  ;;  %v1561_v50 = vpop.permute.xlu0 %1560 }
 0x754   : > { %2738 = vpow2.f32 %v1339_v30 }
 0x759   : > { %v3231_v23 = vpop.eup %2728 }
 0x75a   : > { %v3233_v11 = vpop.eup %2730  ;;  %v1347_v26 = vsel %vm456_vm2, %v3231_v23, 0.0 }
 0x75b   : > { %v3237_v28 = vpop.eup %2732  ;;  %v1350_v31 = vsel %vm456_vm2, %v3233_v11, 0.0 }
 0x75c   : > { %v1353_v34 = vsel %vm456_vm2, %v3237_v28, 0.0 }
 0x75d   : > { %v3241_v33 = vpop.eup %2734 }
 0x75e   : > { %v3245_v35 = vpop.eup %2736  ;;  %v1356_v36 = vsel %vm456_vm2, %v3241_v33, 0.0 }
 0x75f   : > { %v1359_v48 = vsel %vm456_vm2, %v3245_v35, 0.0 }
 0x761   : > { %v3249_v46 = vpop.eup %2738 }
 0x762   : > { %v1362_v49 = vsel %vm456_vm2, %v3249_v46, 0.0 }
 0x764   : > { %1554 = vrot.lane.b32.xlu1 %v2869_v15, %s2804_s3 }
 0x767   : > { %1556 = vrot.lane.b32.xlu0 %v2867_v14, %s2804_s3 }
 0x786   : > { %1348 = vadd.xlane.f32.xlu0 %v1347_v26 }
 0x788   : > { %1351 = vadd.xlane.f32.xlu1 %v1350_v31 }
 0x78a   : > { %1354 = vadd.xlane.f32.xlu0 %v1353_v34 }
 0x78c   : > { %1357 = vadd.xlane.f32.xlu1 %v1356_v36 }
 0x78e   : > { %1360 = vadd.xlane.f32.xlu0 %v1359_v48 }
 0x790   : > { %1363 = vadd.xlane.f32.xlu1 %v1362_v49 }
 0x7a1   : > { %1550 = vrot.lane.b32.xlu1 %v2863_v13, %s2804_s3 }
 0x7a4   : > { %1552 = vrot.lane.b32.xlu0 %v2861_v12, %s2804_s3 }
 0x7a5   : > { %1536 = vrot.lane.b32.xlu1 %v2861_v12, %s2805_s4 }
 0x7a8   : > { %1534 = vrot.lane.b32.xlu0 %v2863_v13, %s2805_s4 }
 0x7a9   : > { %1540 = vrot.lane.b32.xlu1 %v2867_v14, %s2805_s4 }
 0x7ac   : > { %1538 = vrot.lane.b32.xlu0 %v2869_v15, %s2805_s4 }
 0x7ad   : > { %1544 = vrot.lane.b32.xlu1 %v2871_v16, %s2805_s4 }
 0x7b0   : > { %1542 = vrot.lane.b32.xlu0 %v2874_v17, %s2805_s4 }
 0x7b1   : > { %1548 = vrot.lane.b32.xlu1 %v2876_v18, %s2805_s4 }
 0x7b4   : > { %1546 = vrot.lane.b32.xlu0 %v2880_v19, %s2805_s4 }
 0x7da   : > { %v1346_v53 = vpop.xlane.xlu0 %1345 }
 0x7db   : > { %2740 = vrcp.f32 %v1346_v53 }
 0x7dc   : > { %v1343_v52 = vpop.xlane.xlu1 %1342 }
 0x7dd   : > { %2742 = vrcp.f32 %v1343_v52 }
 0x7e8   : > { %v2741_v55 = vpop.eup %2740 }
 0x7e9   : > { %v1374_v58 = vmul.f32 %v2741_v55, %v3219_v54  ;;  %v1557_v54 = vpop.permute.xlu0 %1556 }
 0x7ea   : > { %v2743_v32 = vpop.eup %2742 }
 0x7eb   : > { %v1373_v57 = vmul.f32 %v2743_v32, %v3223_v56  ;;  %v1555_v56 = vpop.permute.xlu1 %1554 }
 0x7ed   : > { %2570 = vmatprep.mubr.msk.f32.mxu0 %vm456_vm2, %v1373_v57 }
 0x7ee   : > { %2571 = vmatmul.mubr.msk.f32.vlgmr.msra.gmra.mxu0 %vm456_vm2, %v1374_v58 }
 0x7ef   : > { %2583 = vmatpush3.xpose.msk.msra.mxu0 %vm310_vm1, %v3185_v61 }
 0x7f0   : > { %2584 = vmatprep.subr.msk.mxu0 %vm310_vm1, %v3217_v47 }
 0x7f3   : > { %2585 = vmatpush3.xpose.msk.msra.mxu0 %vm310_vm1, %v3217_v47 }
 0x7f4   : > { %2586 = vmatprep.subr.msk.mxu0 %vm310_vm1, %v1561_v50 }
 0x7f7   : > { %2587 = vmatpush3.xpose.msk.msra.mxu0 %vm310_vm1, %v1561_v50 }
 0x7f8   : > { %2588 = vmatprep.subr.msk.mxu0 %vm310_vm1, %v1559_v51 }
 0x7fb   : > { %2589 = vmatpush3.xpose.msk.msra.mxu0 %vm310_vm1, %v1559_v51 }
 0x7fc   : > { %2590 = vmatprep.subr.msk.mxu0 %vm310_vm1, %v1557_v54 }
 0x7ff   : > { %2591 = vmatpush3.xpose.msk.msra.mxu0 %vm310_vm1, %v1557_v54 }
 0x800   : > { %2592 = vmatprep.subr.msk.mxu0 %vm310_vm1, %v1555_v56 }
 0x803   : > { %2593 = vmatpush3.xpose.msk.msra.mxu0 %vm310_vm1, %v1555_v56 }
 0x80f   : > { %v1349_v61 = vpop.xlane.xlu0 %1348 }
 0x810   : > { %2744 = vrcp.f32 %v1349_v61 }
 0x811   : > { %v1352_v47 = vpop.xlane.xlu1 %1351 }
 0x812   : > { %2746 = vrcp.f32 %v1352_v47 }
 0x813   : > { %v1355_v59 = vpop.xlane.xlu0 %1354 }
 0x814   : > { %2748 = vrcp.f32 %v1355_v59 }
 0x815   : > { %v1358_v60 = vpop.xlane.xlu1 %1357 }
 0x816   : > { %2750 = vrcp.f32 %v1358_v60 }
 0x817   : > { %v1361_v7 = vpop.xlane.xlu0 %1360 }
 0x818   : > { %2752 = vrcp.f32 %v1361_v7 }
 0x819   : > { %v1364_v8 = vpop.xlane.xlu1 %1363 }
 0x81a   : > { %2754 = vrcp.f32 %v1364_v8 }
 0x81b   : > { %v1553_v9 = vpop.permute.xlu0 %1552 }
 0x81c   : > { %2594 = vmatprep.subr.msk.mxu0 %vm310_vm1, %v1553_v9 }
 0x81d   : > { %v2745_v37 = vpop.eup %2744  ;;  %v1551_v5 = vpop.permute.xlu1 %1550  ;;  %2595 = vmatpush3.xpose.msk.msra.mxu0 %vm310_vm1, %v1553_v9 }
 0x81e   : > { %2596 = vmatprep.subr.msk.mxu0 %vm310_vm1, %v1551_v5  ;;  %v1375_v10 = vmul.f32 %v2745_v37, %v3231_v23 }
 0x81f   : > { %v2747_v20 = vpop.eup %2746  ;;  %v1535_v27 = vpop.permute.xlu0 %1534 }
 0x820   : > { %2573 = vmatprep.mubr.msk.f32.mxu0 %vm456_vm2, %v1375_v10  ;;  %v1376_v21 = vmul.f32 %v2747_v20, %v3233_v11 }
 0x821   : > { %v2749_v22 = vpop.eup %2748  ;;  %2597 = vmatpush3.xpose.msk.msra.mxu0 %vm310_vm1, %v1551_v5  ;;  %v1537_v11 = vpop.permute.xlu1 %1536 }
 0x822   : > { %2574 = vmatmul.mubr.msk.f32.gmra.mxu0 %vm456_vm2, %v1376_v21  ;;  %v1377_v24 = vmul.f32 %v2749_v22, %v3237_v28 }
 0x823   : > { %v2751_v25 = vpop.eup %2750  ;;  %v1539_v34 = vpop.permute.xlu0 %1538 }
 0x824   : > { %2576 = vmatprep.mubr.msk.f32.mxu0 %vm456_vm2, %v1377_v24  ;;  %v1378_v29 = vmul.f32 %v2751_v25, %v3241_v33 }
 0x825   : > { %v2753_v30 = vpop.eup %2752  ;;  %v1541_v28 = vpop.permute.xlu1 %1540 }
 0x826   : > { %2577 = vmatmul.mubr.msk.f32.gmra.mxu0 %vm456_vm2, %v1378_v29  ;;  %v1379_v23 = vmul.f32 %v2753_v30, %v3245_v35 }
 0x827   : > { %v2755_v26 = vpop.eup %2754  ;;  %v1543_v33 = vpop.permute.xlu0 %1542 }
 0x828   : > { %2579 = vmatprep.mubr.msk.f32.mxu0 %vm456_vm2, %v1379_v23  ;;  %v1380_v31 = vmul.f32 %v2755_v26, %v3249_v46 }
 0x829   : > { %v1545_v35 = vpop.permute.xlu1 %1544 }
 0x82a   : > { %2580 = vmatmul.mubr.msk.f32.gmra.mxu0 %vm456_vm2, %v1380_v31 }
 0x82b   : > { %2598 = vmatprep.mubr.msk.f32.mxu0 %vm310_vm1, %v1535_v27  ;;  %v1547_v36 = vpop.permute.xlu0 %1546 }
 0x82d   : > { %v1549_v46 = vpop.permute.xlu1 %1548 }
 0x82e   : > { %2599 = vmatmul.mubr.msk.f32.vlgmr.msra.gmra.mxu0 %vm310_vm1, %v1537_v11 }
 0x82f   : > { %2601 = vmatprep.mubr.msk.f32.mxu0 %vm310_vm1, %v1539_v34 }
 0x832   : > { %2602 = vmatmul.mubr.msk.f32.gmra.mxu0 %vm310_vm1, %v1541_v28 }
 0x833   : > { %2604 = vmatprep.mubr.msk.f32.mxu0 %vm310_vm1, %v1543_v33 }
 0x836   : > { %2605 = vmatmul.mubr.msk.f32.gmra.mxu0 %vm310_vm1, %v1545_v35 }
 0x837   : > { %2607 = vmatprep.mubr.msk.f32.mxu0 %vm310_vm1, %v1547_v36 }
 0x83a   : > { %2608 = vmatmul.mubr.msk.f32.gmra.mxu0 %vm310_vm1, %v1549_v46 }
 0x8ae   : > { %v3309_v48 = vpop.f32.mrf.mxu0 }
 0x8b0   : > { %v3311_v49 = vpop.f32.mrf.mxu0 }
 0x8e2   : > { %v3313_v50 = vpop.f32.mrf.mxu0 }
 0x8e4   : > { %v3315_v51 = vpop.f32.mrf.mxu0 }
 0x8e6   : > { %v3317_v53 = vpop.f32.mrf.mxu0 }
 0x8e8   : > { %v3319_v52 = vpop.f32.mrf.mxu0 }
 0x8ea   : > { %v3321_v55 = vpop.f32.mrf.mxu0 }
 0x8ec   : > { %v3323_v32 = vpop.f32.mrf.mxu0 }
 0x8ee   : > { %v2600_v57 = vpop.f32.mrf.mxu0 }
 0x8ef   : > { %v1704_v58 = vmul.f32 0.35355338, %v2600_v57 }
 0x8f0   : > { %v1664_v54 = vpop.f32.mrf.mxu0 }
 0x8f1   : > { %v1703_v56 = vmul.f32 0.35355338, %v1664_v54  ;;  %v1714_v61 = vsel %vm456_vm2, %v1704_v58, -inf }
 0x8f2   : > { %1715 = vmax.xlane.f32.xlu1 %v1714_v61  ;;  %v2603_v47 = vpop.f32.mrf.mxu0 }
 0x8f3   : > { %v1711_v59 = vsel %vm456_vm2, %v1703_v56, -inf  ;;  %v1706_v9 = vmul.f32 0.35355338, %v2603_v47 }
 0x8f4   : > { %1712 = vmax.xlane.f32.xlu0 %v1711_v59  ;;  %v1674_v60 = vpop.f32.mrf.mxu0 }
 0x8f5   : > { %v1705_v7 = vmul.f32 0.35355338, %v1674_v60  ;;  %v1720_v21 = vsel %vm456_vm2, %v1706_v9, -inf }
 0x8f6   : > { %v2606_v8 = vpop.f32.mrf.mxu0 }
 0x8f7   : > { %v1717_v37 = vsel %vm456_vm2, %v1705_v7, -inf  ;;  %v1708_v20 = vmul.f32 0.35355338, %v2606_v8 }
 0x8f8   : > { %1718 = vmax.xlane.f32.xlu0 %v1717_v37  ;;  %v1684_v5 = vpop.f32.mrf.mxu0 }
 0x8f9   : > { %v1707_v10 = vmul.f32 0.35355338, %v1684_v5  ;;  %v1726_v27 = vsel %vm456_vm2, %v1708_v20, -inf }
 0x8fa   : > { %v2609_v24 = vpop.f32.mrf.mxu0 }
 0x8fb   : > { %v1723_v22 = vsel %vm456_vm2, %v1707_v10, -inf  ;;  %v1710_v25 = vmul.f32 0.35355338, %v2609_v24 }
 0x8fc   : > { %1721 = vmax.xlane.f32.xlu0 %v1720_v21  ;;  %1724 = vmax.xlane.f32.xlu1 %v1723_v22  ;;  %v1694_v30 = vpop.f32.mrf.mxu0 }
 0x8fd   : > { %v1732_v29 = vsel %vm456_vm2, %v1710_v25, -inf  ;;  %v3340_v23 = vmul.f32 0.35355338, %v1694_v30 }
 0x8ff   : > { %v1729_v26 = vsel %vm456_vm2, %v3340_v23, -inf }
 0x900   : > { %1727 = vmax.xlane.f32.xlu0 %v1726_v27 }
 0x904   : > { %1733 = vmax.xlane.f32.xlu0 %v1732_v29 }
 0x90d   : > { %1813 = vrot.lane.b32.xlu1 %v2876_v18, %s2806_s5 }
 0x911   : > { %1809 = vrot.lane.b32.xlu1 %v2871_v16, %s2806_s5 }
 0x91a   : > { %1811 = vrot.lane.b32.xlu0 %v2880_v19, %s2806_s5 }
 0x91e   : > { %1805 = vrot.lane.b32.xlu0 %v2867_v14, %s2806_s5 }
 0x935   : > { %1730 = vmax.xlane.f32.xlu1 %v1729_v26 }
 0x946   : > { %1807 = vrot.lane.b32.xlu1 %v2874_v17, %s2806_s5 }
 0x94a   : > { %1803 = vrot.lane.b32.xlu1 %v2869_v15, %s2806_s5 }
 0x97b   : > { %v1716_v16 = vpop.xlane.xlu1 %1715 }
 0x97c   : > { %v1736_v18 = vsub.f32 %v1704_v58, %v1716_v16 }
 0x97d   : > { %v1713_v11 = vpop.xlane.xlu0 %1712 }
 0x97e   : > { %v1745_v19 = vmul.f32 1.442695, %v1736_v18  ;;  %v1735_v31 = vsub.f32 %v1703_v56, %v1713_v11 }
 0x980   : > { %2756 = vpow2.f32 %v1745_v19  ;;  %v1743_v14 = vmul.f32 1.442695, %v1735_v31 }
 0x981   : > { %v1719_v34 = vpop.xlane.xlu0 %1718 }
 0x982   : > { %2758 = vpow2.f32 %v1743_v14  ;;  %v1737_v28 = vsub.f32 %v1705_v7, %v1719_v34 }
 0x984   : > { %v1747_v33 = vmul.f32 1.442695, %v1737_v28 }
 0x985   : > { %v1725_v35 = vpop.xlane.xlu1 %1724  ;;  %v1722_v36 = vpop.xlane.xlu0 %1721 }
 0x986   : > { %2760 = vpow2.f32 %v1747_v33  ;;  %v1739_v46 = vsub.f32 %v1707_v10, %v1725_v35  ;;  %v1738_v57 = vsub.f32 %v1706_v9, %v1722_v36 }
 0x988   : > { %v1751_v17 = vmul.f32 1.442695, %v1739_v46  ;;  %v1749_v54 = vmul.f32 1.442695, %v1738_v57 }
 0x989   : > { %v1814_v61 = vpop.permute.xlu1 %1813  ;;  %v1728_v15 = vpop.xlane.xlu0 %1727 }
 0x98a   : > { %2762 = vpow2.f32 %v1751_v17  ;;  %v1740_v58 = vsub.f32 %v1708_v20, %v1728_v15  ;;  %2610 = vmatprep.subr.mxu1 %v1814_v61 }
 0x98b   : > { %2764 = vpow2.f32 %v1749_v54  ;;  %2611 = vmatpush3.msra.mxu1 %v1814_v61 }
 0x98c   : > { %v1753_v56 = vmul.f32 1.442695, %v1740_v58 }
 0x98d   : > { %v3348_v47 = vpop.eup %2756  ;;  %v1734_v59 = vpop.xlane.xlu0 %1733 }
 0x98e   : > { %2766 = vpow2.f32 %v1753_v56  ;;  %v1742_v60 = vsub.f32 %v1710_v25, %v1734_v59  ;;  %v1762_v7 = vsel %vm456_vm2, %v3348_v47, 0.0  ;;  %v1810_v20 = vpop.permute.xlu1 %1809 }
 0x98f   : > { %v3352_v8 = vpop.eup %2758  ;;  %1763 = vadd.xlane.f32.xlu0 %v1762_v7 }
 0x990   : > { %v1757_v9 = vmul.f32 1.442695, %v1742_v60  ;;  %v1759_v37 = vsel %vm456_vm2, %v3352_v8, 0.0 }
 0x991   : > { %1760 = vadd.xlane.f32.xlu1 %v1759_v37  ;;  %v1812_v5 = vpop.permute.xlu0 %1811 }
 0x992   : > { %2768 = vpow2.f32 %v1757_v9  ;;  %2612 = vmatprep.subr.mxu1 %v1812_v5 }
 0x993   : > { %v3356_v10 = vpop.eup %2760  ;;  %2613 = vmatpush3.msra.mxu1 %v1812_v5 }
 0x994   : > { %2614 = vmatprep.subr.mxu1 %v1810_v20  ;;  %v1765_v21 = vsel %vm456_vm2, %v3356_v10, 0.0 }
 0x995   : > { %1766 = vadd.xlane.f32.xlu1 %v1765_v21  ;;  %2615 = vmatpush3.msra.mxu1 %v1810_v20  ;;  %v1806_v14 = vpop.permute.xlu0 %1805 }
 0x997   : > { %v3360_v22 = vpop.eup %2762 }
 0x998   : > { %v3362_v24 = vpop.eup %2764  ;;  %v1771_v25 = vsel %vm456_vm2, %v3360_v22, 0.0 }
 0x999   : > { %1772 = vadd.xlane.f32.xlu1 %v1771_v25  ;;  %v1768_v27 = vsel %vm456_vm2, %v3362_v24, 0.0 }
 0x99a   : > { %1769 = vadd.xlane.f32.xlu0 %v1768_v27 }
 0x99b   : > { %v3368_v29 = vpop.eup %2766 }
 0x99c   : > { %v1774_v30 = vsel %vm456_vm2, %v3368_v29, 0.0 }
 0x99e   : > { %1775 = vadd.xlane.f32.xlu0 %v1774_v30 }
 0x99f   : > { %v3372_v26 = vpop.eup %2768 }
 0x9a0   : > { %v1780_v16 = vsel %vm456_vm2, %v3372_v26, 0.0 }
 0x9a2   : > { %1781 = vadd.xlane.f32.xlu0 %v1780_v16 }
 0x9b8   : > { %1801 = vrot.lane.b32.xlu0 %v2861_v12, %s2806_s5 }
 0x9bc   : > { %1960 = vrot.lane.b32.xlu0 %v3191_v63, %s2807_s6 }
 0x9be   : > { %v1731_v18 = vpop.xlane.xlu1 %1730 }
 0x9bf   : > { %v1741_v11 = vsub.f32 %v3340_v23, %v1731_v18 }
 0x9c0   : > { %1964 = vrot.lane.b32.xlu0 %v3195_v1, %s2807_s6 }
 0x9c1   : > { %v1755_v19 = vmul.f32 1.442695, %v1741_v11 }
 0x9c2   : > { %v1808_v31 = vpop.permute.xlu1 %1807 }
 0x9c3   : > { %2770 = vpow2.f32 %v1755_v19  ;;  %2616 = vmatprep.subr.mxu1 %v1808_v31 }
 0x9c4   : > { %1968 = vrot.lane.b32.xlu0 %v3199_v3, %s2807_s6  ;;  %2617 = vmatpush3.msra.mxu1 %v1808_v31 }
 0x9c5   : > { %2618 = vmatprep.subr.mxu1 %v1806_v14 }
 0x9c6   : > { %v1804_v34 = vpop.permute.xlu1 %1803  ;;  %2619 = vmatpush3.msra.mxu1 %v1806_v14 }
 0x9c7   : > { %2620 = vmatprep.subr.mxu1 %v1804_v34 }
 0x9c8   : > { %1972 = vrot.lane.b32.xlu0 %v3203_v6, %s2807_s6  ;;  %2621 = vmatpush3.msra.mxu1 %v1804_v34 }
 0x9cc   : > { %1992 = vrot.lane.b32.xlu0 %v3311_v49, %s2808_s7 }
 0x9d0   : > { %v2771_v12 = vpop.eup %2770  ;;  %1996 = vrot.lane.b32.xlu0 %v3315_v51, %s2808_s7 }
 0x9d1   : > { %v1777_v63 = vsel %vm456_vm2, %v2771_v12, 0.0 }
 0x9d2   : > { %1778 = vadd.xlane.f32.xlu1 %v1777_v63 }
 0x9d4   : > { %2000 = vrot.lane.b32.xlu0 %v3319_v52, %s2808_s7 }
 0x9d8   : > { %2004 = vrot.lane.b32.xlu0 %v3323_v32, %s2808_s7 }
 0x9e3   : > { %1799 = vrot.lane.b32.xlu1 %v2863_v13, %s2806_s5 }
 0x9e7   : > { %1962 = vrot.lane.b32.xlu1 %v3189_v62, %s2807_s6 }
 0x9eb   : > { %1966 = vrot.lane.b32.xlu1 %v3193_v0, %s2807_s6 }
 0x9ef   : > { %1970 = vrot.lane.b32.xlu1 %v3197_v2, %s2807_s6 }
 0x9f3   : > { %1974 = vrot.lane.b32.xlu1 %v3201_v4, %s2807_s6 }
 0x9f7   : > { %1994 = vrot.lane.b32.xlu1 %v3309_v48, %s2808_s7 }
 0x9fb   : > { %1998 = vrot.lane.b32.xlu1 %v3313_v50, %s2808_s7 }
 0x9ff   : > { %2002 = vrot.lane.b32.xlu1 %v3317_v53, %s2808_s7 }
 0xa03   : > { %2006 = vrot.lane.b32.xlu1 %v3321_v55, %s2808_s7 }
 0xa18   : > { %v1764_v3 = vpop.xlane.xlu0 %1763 }
 0xa1a   : > { %v1761_v1 = vpop.xlane.xlu1 %1760 }
 0xa1b   : > { %2772 = vrcp.f32 %v1761_v1 }
 0xa1c   : > { %2774 = vrcp.f32 %v1764_v3 }
 0xa1e   : > { %v1767_v4 = vpop.xlane.xlu1 %1766 }
 0xa1f   : > { %2776 = vrcp.f32 %v1767_v4 }
 0xa22   : > { %v1773_v48 = vpop.xlane.xlu1 %1772 }
 0xa23   : > { %v1770_v13 = vpop.xlane.xlu0 %1769 }
 0xa24   : > { %2778 = vrcp.f32 %v1770_v13 }
 0xa25   : > { %2780 = vrcp.f32 %v1773_v48 }
 0xa27   : > { %v1776_v6 = vpop.xlane.xlu0 %1775 }
 0xa28   : > { %v2773_v62 = vpop.eup %2772  ;;  %2782 = vrcp.f32 %v1776_v6 }
 0xa29   : > { %v1791_v0 = vmul.f32 %v2773_v62, %v3352_v8  ;;  %v2775_v51 = vpop.eup %2774 }
 0xa2a   : > { %v1792_v55 = vmul.f32 %v2775_v51, %v3348_v47 }
 0xa2b   : > { %v1782_v49 = vpop.xlane.xlu0 %1781  ;;  %2626 = vmatprep.mubr.msk.f32.mxu1 %vm456_vm2, %v1791_v0 }
 0xa2c   : > { %2784 = vrcp.f32 %v1782_v49  ;;  %v2777_v53 = vpop.eup %2776 }
 0xa2d   : > { %v1793_v23 = vmul.f32 %v2777_v53, %v3356_v10 }
 0xa2f   : > { %v1802_v2 = vpop.permute.xlu0 %1801 }
 0xa30   : > { %2622 = vmatprep.subr.mxu1 %v1802_v2 }
 0xa31   : > { %2623 = vmatpush3.msra.mxu1 %v1802_v2  ;;  %v2779_v32 = vpop.eup %2778 }
 0xa32   : > { %v2781_v28 = vpop.eup %2780  ;;  %v1794_v33 = vmul.f32 %v2779_v32, %v3362_v24 }
 0xa33   : > { %v1795_v36 = vmul.f32 %v2781_v28, %v3360_v22  ;;  %v1961_v37 = vpop.permute.xlu0 %1960 }
 0xa34   : > { %v2048_v34 = vsel %vm310_vm1, %v3055_v39, %v1961_v37 }
 0xa35   : > { %v2783_v35 = vpop.eup %2782 }
 0xa36   : > { %v1796_v57 = vmul.f32 %v2783_v35, %v3368_v29 }
 0xa37   : > { %v1965_v10 = vpop.permute.xlu0 %1964 }
 0xa38   : > { %v2050_v39 = vsel %vm310_vm1, %v3059_v41, %v1965_v10 }
 0xa39   : > { %v2785_v46 = vpop.eup %2784 }
 0xa3a   : > { %v1798_v61 = vmul.f32 %v2785_v46, %v3372_v26 }
 0xa3b   : > { %v1969_v21 = vpop.permute.xlu0 %1968 }
 0xa3c   : > { %v2052_v41 = vsel %vm310_vm1, %v3063_v43, %v1969_v21 }
 0xa3f   : > { %v1973_v24 = vpop.permute.xlu0 %1972 }
 0xa40   : > { %v2054_v43 = vsel %vm310_vm1, %v3067_v45, %v1973_v24 }
 0xa43   : > { %v1993_v27 = vpop.permute.xlu0 %1992 }
 0xa44   : > { %v2057_v63 = vsel %vm2056_vm4, %v2048_v34, %v1993_v27 }
 0xa47   : > { %v1997_v30 = vpop.permute.xlu0 %1996 }
 0xa48   : > { %v2059_v0 = vsel %vm2056_vm4, %v2050_v39, %v1997_v30 }
 0xa4b   : > { %v2001_v16 = vpop.permute.xlu0 %2000 }
 0xa4c   : > { %v2061_v51 = vsel %vm2056_vm4, %v2052_v41, %v2001_v16 }
 0xa4f   : > { %v2005_v11 = vpop.permute.xlu0 %2004 }
 0xa50   : > { %v2063_v28 = vsel %vm2056_vm4, %v2054_v43, %v2005_v11 }
 0xa5b   : > { %v1779_v50 = vpop.xlane.xlu1 %1778 }
 0xa5c   : > { %2786 = vrcp.f32 %v1779_v50 }
 0xa5f   : > { %v1800_v52 = vpop.permute.xlu1 %1799 }
 0xa60   : > { %2624 = vmatprep.subr.mxu1 %v1800_v52 }
 0xa61   : > { %2625 = vmatpush3.msra.mxu1 %v1800_v52 }
 0xa62   : > { %2627 = vmatmul.mubr.msk.f32.vlgmr.msra.gmra.mxu1 %vm456_vm2, %v1792_v55 }
 0xa63   : > { %2629 = vmatprep.mubr.msk.f32.mxu1 %vm456_vm2, %v1793_v23  ;;  %v1963_v9 = vpop.permute.xlu1 %1962 }
 0xa64   : > { %v2049_v19 = vsel %vm310_vm1, %v3053_v38, %v1963_v9 }
 0xa66   : > { %2630 = vmatmul.mubr.msk.f32.gmra.mxu1 %vm456_vm2, %v1794_v33 }
 0xa67   : > { %2632 = vmatprep.mubr.msk.f32.mxu1 %vm456_vm2, %v1795_v36  ;;  %v1967_v5 = vpop.permute.xlu1 %1966 }
 0xa68   : > { %v2051_v3 = vsel %vm310_vm1, %v3057_v40, %v1967_v5 }
 0xa69   : > { %v2787_v17 = vpop.eup %2786 }
 0xa6a   : > { %2633 = vmatmul.mubr.msk.f32.gmra.mxu1 %vm456_vm2, %v1796_v57  ;;  %v1797_v54 = vmul.f32 %v2787_v17, %v2771_v12 }
 0xa6b   : > { %v1971_v20 = vpop.permute.xlu1 %1970 }
 0xa6c   : > { %2635 = vmatprep.mubr.msk.f32.mxu1 %vm456_vm2, %v1797_v54  ;;  %v2053_v40 = vsel %vm310_vm1, %v3061_v42, %v1971_v20 }
 0xa6e   : > { %2636 = vmatmul.mubr.msk.f32.gmra.mxu1 %vm456_vm2, %v1798_v61 }
 0xa6f   : > { %v1975_v22 = vpop.permute.xlu1 %1974 }
 0xa70   : > { %v2055_v42 = vsel %vm310_vm1, %v3065_v44, %v1975_v22 }
 0xa73   : > { %v1995_v25 = vpop.permute.xlu1 %1994 }
 0xa74   : > { %v2058_v31 = vsel %vm2056_vm4, %v2049_v19, %v1995_v25 }
 0xa77   : > { %v1999_v29 = vpop.permute.xlu1 %1998 }
 0xa78   : > { %v2060_v13 = vsel %vm2056_vm4, %v2051_v3, %v1999_v29 }
 0xa7b   : > { %v2003_v26 = vpop.permute.xlu1 %2002 }
 0xa7c   : > { %v2062_v4 = vsel %vm2056_vm4, %v2053_v40, %v2003_v26 }
 0xa7f   : > { %v2007_v18 = vpop.permute.xlu1 %2006 }
 0xa80   : > { %v2064_v55 = vsel %vm2056_vm4, %v2055_v42, %v2007_v18 }
 0xb22   : > { %v2628_v15 = vpop.f32.mrf.mxu1 }
 0xb23   : > { %2026 = vrot.lane.b32.xlu1 %v2628_v15, %s2809_s8 }
 0xb24   : > { %v1913_v58 = vpop.f32.mrf.mxu1 }
 0xb25   : > { %2024 = vrot.lane.b32.xlu0 %v1913_v58, %s2809_s8 }
 0xb26   : > { %v2631_v56 = vpop.f32.mrf.mxu1 }
 0xb27   : > { %2030 = vrot.lane.b32.xlu1 %v2631_v56, %s2809_s8 }
 0xb28   : > { %v1923_v47 = vpop.f32.mrf.mxu1 }
 0xb29   : > { %2028 = vrot.lane.b32.xlu0 %v1923_v47, %s2809_s8 }
 0xb2a   : > { %v2634_v59 = vpop.f32.mrf.mxu1 }
 0xb2b   : > { %2034 = vrot.lane.b32.xlu1 %v2634_v59, %s2809_s8 }
 0xb2c   : > { %v1933_v60 = vpop.f32.mrf.mxu1 }
 0xb2d   : > { %2032 = vrot.lane.b32.xlu0 %v1933_v60, %s2809_s8 }
 0xb2e   : > { %v2637_v7 = vpop.f32.mrf.mxu1 }
 0xb2f   : > { %2038 = vrot.lane.b32.xlu1 %v2637_v7, %s2809_s8 }
 0xb30   : > { %v1943_v8 = vpop.f32.mrf.mxu1 }
 0xb31   : > { %2036 = vrot.lane.b32.xlu0 %v1943_v8, %s2809_s8 }
 0xb95   : > { %v2027_v14 = vpop.permute.xlu1 %2026 }
 0xb96   : > { %v2067_v12 = vsel %vm2065_vm3, %v2058_v31, %v2027_v14 }
 0xb97   : > { %2075 = vst.msk [vmem:[%s3418_s13 + $0x8] sm:$0xff] %vm156_vm0, %v2067_v12  ;;  %v2025_v1 = vpop.permute.xlu0 %2024 }
 0xb98   : > { %v2066_v38 = vsel %vm2065_vm3, %v2057_v63, %v2025_v1 }
 0xb99   : > { %2074 = vst.msk [vmem:[%s3418_s13] sm:$0xff] %vm156_vm0, %v2066_v38  ;;  %v2031_v6 = vpop.permute.xlu1 %2030 }
 0xb9a   : > { %v2069_v62 = vsel %vm2065_vm3, %v2060_v13, %v2031_v6 }
 0xb9b   : > { %2077 = vst.msk [vmem:[%s3418_s13 + $0x18] sm:$0xff] %vm156_vm0, %v2069_v62  ;;  %v2029_v49 = vpop.permute.xlu0 %2028 }
 0xb9c   : > { %v2068_v2 = vsel %vm2065_vm3, %v2059_v0, %v2029_v49 }
 0xb9d   : > { %2076 = vst.msk [vmem:[%s3418_s13 + $0x10] sm:$0xff] %vm156_vm0, %v2068_v2  ;;  %v2035_v48 = vpop.permute.xlu1 %2034 }
 0xb9e   : > { %v2071_v50 = vsel %vm2065_vm3, %v2062_v4, %v2035_v48 }
 0xb9f   : > { %2079 = vst.msk [vmem:[%s3418_s13 + $0x28] sm:$0xff] %vm156_vm0, %v2071_v50  ;;  %v2033_v53 = vpop.permute.xlu0 %2032 }
 0xba0   : > { %v2070_v52 = vsel %vm2065_vm3, %v2061_v51, %v2033_v53 }
 0xba1   : > { %2078 = vst.msk [vmem:[%s3418_s13 + $0x20] sm:$0xff] %vm156_vm0, %v2070_v52  ;;  %v2039_v32 = vpop.permute.xlu1 %2038 }
 0xba2   : > { %v2073_v23 = vsel %vm2065_vm3, %v2064_v55, %v2039_v32 }
 0xba3   : > { %2081 = vst.msk [vmem:[%s3418_s13 + $0x38] sm:$0xff] %vm156_vm0, %v2073_v23  ;;  %v2037_v33 = vpop.permute.xlu0 %2036 }
 0xba4   : > { %v2072_v35 = vsel %vm2065_vm3, %v2063_v28, %v2037_v33 }
 0xba5   : > { %2080 = vst.msk [vmem:[%s3418_s13 + $0x30] sm:$0xff] %vm156_vm0, %v2072_v35 }
 0xba6 PF: > { %s12_s9 = sadd.s32 1, %s2794_s9  }
 0xba7   : > { %p9_p4 = scmp.ge.s32.totalorder %s12_s9, 4  }
 0xba9   :  { %11 = sbr.rel (!%p9_p4) target bundleno = 1 (0x1), region = 58 }

</bundles_post_ra>
